<compile_context>
chip_gen: v7x
topology: tpu7x:2x2x1
jax: 0.10.0
libtpu: 0.0.40
codegen_flags: <defaults>
</compile_context>

<pallas_src>
import functools

import jax
import jax.numpy as jnp
from jax.experimental import pallas as pl
from jax.experimental.pallas import tpu as pltpu  # noqa: F401  (TPU backend)


# ----------------------------------------------------------------------------
# Fused kernel: hoisted layer-0 projection + stacked GRU recurrence + fc.
# ----------------------------------------------------------------------------
def _rnn_gru_fused_kernel(num_layers, seq_len, batch, hidden, *refs):
    """refs layout:
        [0]                      x2d      (S*B, D)
        [1 + 4*l + 0]            w_ih_l   (D_l, 3H)   gate order [r, z, n]
        [1 + 4*l + 1]            w_hh_l   (H, 3H)
        [1 + 4*l + 2]            b_ig_l   (1, 3H)     = [bih_r+bhh_r, bih_z+bhh_z, bih_n]
        [1 + 4*l + 3]            b_hn_l   (1, H)      = bhh_n
        [1 + 4*L + 0]            fc_w     (H, C)
        [1 + 4*L + 1]            fc_b     (1, C)
        [1 + 4*L + 2]            out      (B, C)
    """
    H = hidden
    x_ref = refs[0]
    layer_refs = refs[1:1 + 4 * num_layers]
    fc_w_ref = refs[1 + 4 * num_layers]
    fc_b_ref = refs[2 + 4 * num_layers]
    out_ref = refs[3 + 4 * num_layers]

    # ---- Hoisted layer-0 input projection: ONE big MXU matmul for the whole
    # sequence (this contraction over D dominates the FLOPs of the model).
    ig0 = (jnp.dot(x_ref[...], layer_refs[0][...],
                   preferred_element_type=jnp.float32)
           + layer_refs[2][...])                       # (S*B, 3H)

    # ---- Hoist per-step operands (small) out of the unrolled time loop.
    w_ih = [layer_refs[4 * l + 0][...] for l in range(num_layers)]
    w_hh = [layer_refs[4 * l + 1][...] for l in range(num_layers)]
    b_ig = [layer_refs[4 * l + 2][...] for l in range(num_layers)]
    b_hn = [layer_refs[4 * l + 3][...] for l in range(num_layers)]

    # Zero initial hidden state for every layer (torch.zeros).
    hs = [jnp.zeros((batch, H), jnp.float32) for _ in range(num_layers)]

    # Statically unrolled sequential recurrence (S is small for this module).
    for t in range(seq_len):
        x_in = None
        for l in range(num_layers):
            h = hs[l]
            if l == 0:
                ig = ig0[t * batch:(t + 1) * batch, :]          # precomputed
            else:
                # Input dim is only H here, so the per-step matmul is tiny.
                ig = (jnp.dot(x_in, w_ih[l],
                              preferred_element_type=jnp.float32) + b_ig[l])
            hg = jnp.dot(h, w_hh[l], preferred_element_type=jnp.float32)

            # PyTorch GRU gate math, gate order [r, z, n]:
            r = jax.nn.sigmoid(ig[:, 0:H] + hg[:, 0:H])
            z = jax.nn.sigmoid(ig[:, H:2 * H] + hg[:, H:2 * H])
            n = jnp.tanh(ig[:, 2 * H:3 * H] + r * (hg[:, 2 * H:3 * H] + b_hn[l]))
            h_new = (1.0 - z) * n + z * h

            hs[l] = h_new
            x_in = h_new        # input to the next stacked layer at time t

    # ---- Final fc on the last timestep of the top layer (output[-1]).
    logits = (jnp.dot(hs[-1], fc_w_ref[...],
                      preferred_element_type=jnp.float32) + fc_b_ref[...])
    out_ref[...] = logits.astype(out_ref.dtype)


# ----------------------------------------------------------------------------
# Module wrapper: RNN_GRU.forward
# ----------------------------------------------------------------------------
def init_params(key, input_size, hidden_size, num_layers, num_classes):
    """PyTorch-style U(-1/sqrt(H), 1/sqrt(H)) init, gate-concatenated layout:
       w_ih: (D, 3H), w_hh: (H, 3H), b_ih/b_hh: (1, 3H); gate order [r, z, n]."""
    H = hidden_size
    k = 1.0 / jnp.sqrt(jnp.float32(H))
    params = {"layers": []}
    for layer in range(num_layers):
        d_in = input_size if layer == 0 else H
        key, k1, k2, k3, k4 = jax.random.split(key, 5)
        params["layers"].append({
            "w_ih": jax.random.uniform(k1, (d_in, 3 * H), jnp.float32, -k, k),
            "w_hh": jax.random.uniform(k2, (H, 3 * H), jnp.float32, -k, k),
            "b_ih": jax.random.uniform(k3, (1, 3 * H), jnp.float32, -k, k),
            "b_hh": jax.random.uniform(k4, (1, 3 * H), jnp.float32, -k, k),
        })
    key, k1, k2 = jax.random.split(key, 3)
    params["fc_w"] = jax.random.uniform(k1, (H, num_classes), jnp.float32, -k, k)
    params["fc_b"] = jax.random.uniform(k2, (1, num_classes), jnp.float32, -k, k)
    return params


@jax.jit
def rnn_gru_forward(x, params):
    """x: (S, B, input_size) -> logits (B, num_classes).

    Matches RNN_GRU.forward: zero initial hidden, stacked unidirectional GRU,
    then fc applied to output[-1] (last timestep of the top layer).
    Whole forward pass is a single gridless pallas_call.
    """
    S, B, D = x.shape
    L = len(params["layers"])
    H = params["layers"][0]["w_hh"].shape[0]
    C = params["fc_w"].shape[-1]

    flat_inputs = [x.reshape(S * B, D)]                     # free reshape in XLA
    in_specs = [pl.BlockSpec((S * B, D), lambda: (0, 0))]

    for lp in params["layers"]:
        d_in = lp["w_ih"].shape[0]
        # Fold biases: r/z gates get b_ih+b_hh up front, n gate keeps b_ih up
        # front and b_hh_n inside the r*(...) term.
        b_ig = jnp.concatenate(
            [lp["b_ih"][:, :2 * H] + lp["b_hh"][:, :2 * H],
             lp["b_ih"][:, 2 * H:]], axis=-1)               # (1, 3H)
        b_hn = lp["b_hh"][:, 2 * H:]                        # (1, H)
        flat_inputs += [lp["w_ih"], lp["w_hh"], b_ig, b_hn]
        in_specs += [
            pl.BlockSpec((d_in, 3 * H), lambda: (0, 0)),
            pl.BlockSpec((H, 3 * H), lambda: (0, 0)),
            pl.BlockSpec((1, 3 * H), lambda: (0, 0)),
            pl.BlockSpec((1, H), lambda: (0, 0)),
        ]

    flat_inputs += [params["fc_w"], params["fc_b"]]
    in_specs += [pl.BlockSpec((H, C), lambda: (0, 0)),
                 pl.BlockSpec((1, C), lambda: (0, 0))]

    kernel = functools.partial(_rnn_gru_fused_kernel, L, S, B, H)
    return pl.pallas_call(
        kernel,
        out_shape=jax.ShapeDtypeStruct((B, C), jnp.float32),
        in_specs=in_specs,
        out_specs=pl.BlockSpec((B, C), lambda: (0, 0)),
    )(*flat_inputs)


# ----------------------------------------------------------------------------
# Pure-JAX reference for correctness checking
# ----------------------------------------------------------------------------
def rnn_gru_reference(x, params):
    H = params["layers"][0]["w_hh"].shape[0]
    y = x
    for lp in params["layers"]:
        S, B, _ = y.shape
        h = jnp.zeros((B, H), jnp.float32)
        outs = []
        for t in range(S):
            xt = y[t]
            gi = xt @ lp["w_ih"] + lp["b_ih"]
            gh = h @ lp["w_hh"] + lp["b_hh"]
            r = jax.nn.sigmoid(gi[:, :H] + gh[:, :H])
            z = jax.nn.sigmoid(gi[:, H:2 * H] + gh[:, H:2 * H])
            n = jnp.tanh(gi[:, 2 * H:] + r * gh[:, 2 * H:])
            h = (1.0 - z) * n + z * h
            outs.append(h)
        y = jnp.stack(outs, axis=0)
    return y[-1] @ params["fc_w"] + params["fc_b"]


if __name__ == "__main__":
    # Small shapes consistent with the module:
    #   seq_len=8, batch=2, input_size=512 (resnet18/34 branch),
    #   num_layers=2, hidden_size=32, num_classes=2, bidirectional=False.
    SEQ, BATCH, INPUT_SIZE = 8, 2, 512
    NUM_LAYERS, HIDDEN, NUM_CLASSES = 2, 32, 2

    key = jax.random.PRNGKey(0)
    key, kx = jax.random.split(key)
    x = jax.random.normal(kx, (SEQ, BATCH, INPUT_SIZE), jnp.float32)
    params = init_params(key, INPUT_SIZE, HIDDEN, NUM_LAYERS, NUM_CLASSES)

    logits = rnn_gru_forward(x, params)
    jax.block_until_ready(logits)

    ref = rnn_gru_reference(x, params)
    assert logits.shape == (BATCH, NUM_CLASSES)
    assert jnp.allclose(logits, ref, atol=1e-4, rtol=1e-4)

    print("KERNEL_OK")
</pallas_src>

<mosaic_0001>
module attributes {stable_mosaic.version = 11 : i64} {
  func.func @_rnn_gru_fused_kernel(%arg0: memref<16x512xf32, #tpu.memory_space<vmem>>, %arg1: memref<512x96xf32, #tpu.memory_space<vmem>>, %arg2: memref<32x96xf32, #tpu.memory_space<vmem>>, %arg3: memref<1x96xf32, #tpu.memory_space<vmem>>, %arg4: memref<1x32xf32, #tpu.memory_space<vmem>>, %arg5: memref<32x96xf32, #tpu.memory_space<vmem>>, %arg6: memref<32x96xf32, #tpu.memory_space<vmem>>, %arg7: memref<1x96xf32, #tpu.memory_space<vmem>>, %arg8: memref<1x32xf32, #tpu.memory_space<vmem>>, %arg9: memref<32x2xf32, #tpu.memory_space<vmem>>, %arg10: memref<1x2xf32, #tpu.memory_space<vmem>>, %arg11: memref<2x2xf32, #tpu.memory_space<vmem>>) attributes {dimension_semantics = [], scalar_prefetch = 0 : i64, scratch_operands = 0 : i64, tpu.core_type = #tpu.core_type<tc>} {
    %c0 = arith.constant 0 : index
    %c0_0 = arith.constant 0 : index
    %0 = vector.load %arg0[%c0, %c0_0] : memref<16x512xf32, #tpu.memory_space<vmem>>, vector<16x512xf32>
    %c0_1 = arith.constant 0 : index
    %c0_2 = arith.constant 0 : index
    %1 = vector.load %arg1[%c0_1, %c0_2] : memref<512x96xf32, #tpu.memory_space<vmem>>, vector<512x96xf32>
    %cst = arith.constant dense<0.000000e+00> : vector<16x96xf32>
    %2 = tpu.matmul %0, %1, %cst {dimension_numbers = #tpu.dot_dimension_numbers<[1], [0], [0], [1], [0, 0, 1, 1], [], []>} : vector<16x512xf32>, vector<512x96xf32>, vector<16x96xf32> -> vector<16x96xf32>
    %c0_3 = arith.constant 0 : index
    %c0_4 = arith.constant 0 : index
    %3 = vector.load %arg3[%c0_3, %c0_4] : memref<1x96xf32, #tpu.memory_space<vmem>>, vector<1x96xf32>
    %4 = vector.broadcast %3 : vector<1x96xf32> to vector<16x96xf32>
    %5 = arith.addf %2, %4 : vector<16x96xf32>
    %c0_5 = arith.constant 0 : index
    %c0_6 = arith.constant 0 : index
    %6 = vector.load %arg5[%c0_5, %c0_6] : memref<32x96xf32, #tpu.memory_space<vmem>>, vector<32x96xf32>
    %c0_7 = arith.constant 0 : index
    %c0_8 = arith.constant 0 : index
    %7 = vector.load %arg2[%c0_7, %c0_8] : memref<32x96xf32, #tpu.memory_space<vmem>>, vector<32x96xf32>
    %c0_9 = arith.constant 0 : index
    %c0_10 = arith.constant 0 : index
    %8 = vector.load %arg6[%c0_9, %c0_10] : memref<32x96xf32, #tpu.memory_space<vmem>>, vector<32x96xf32>
    %c0_11 = arith.constant 0 : index
    %c0_12 = arith.constant 0 : index
    %9 = vector.load %arg7[%c0_11, %c0_12] : memref<1x96xf32, #tpu.memory_space<vmem>>, vector<1x96xf32>
    %c0_13 = arith.constant 0 : index
    %c0_14 = arith.constant 0 : index
    %10 = vector.load %arg4[%c0_13, %c0_14] : memref<1x32xf32, #tpu.memory_space<vmem>>, vector<1x32xf32>
    %c0_15 = arith.constant 0 : index
    %c0_16 = arith.constant 0 : index
    %11 = vector.load %arg8[%c0_15, %c0_16] : memref<1x32xf32, #tpu.memory_space<vmem>>, vector<1x32xf32>
    %cst_17 = arith.constant 0.000000e+00 : f32
    %12 = vector.broadcast %cst_17 : f32 to vector<2x32xf32>
    %cst_18 = arith.constant 0.000000e+00 : f32
    %13 = vector.broadcast %cst_18 : f32 to vector<2x32xf32>
    %14 = vector.extract_strided_slice %5 {offsets = [0, 0], sizes = [2, 96], strides = [1, 1]} : vector<16x96xf32> to vector<2x96xf32>
    %cst_19 = arith.constant dense<0.000000e+00> : vector<2x96xf32>
    %15 = tpu.matmul %12, %7, %cst_19 {dimension_numbers = #tpu.dot_dimension_numbers<[1], [0], [0], [1], [0, 0, 1, 1], [], []>} : vector<2x32xf32>, vector<32x96xf32>, vector<2x96xf32> -> vector<2x96xf32>
    %16 = vector.extract_strided_slice %14 {offsets = [0, 0], sizes = [2, 32], strides = [1, 1]} : vector<2x96xf32> to vector<2x32xf32>
    %17 = vector.extract_strided_slice %15 {offsets = [0, 0], sizes = [2, 32], strides = [1, 1]} : vector<2x96xf32> to vector<2x32xf32>
    %18 = arith.addf %16, %17 : vector<2x32xf32>
    %19 = arith.negf %18 : vector<2x32xf32>
    %20 = math.exp %19 : vector<2x32xf32>
    %cst_20 = arith.constant 1.000000e+00 : f32
    %21 = vector.broadcast %cst_20 : f32 to vector<2x32xf32>
    %22 = arith.addf %21, %20 : vector<2x32xf32>
    %23 = arith.divf %21, %22 : vector<2x32xf32>
    %24 = vector.extract_strided_slice %14 {offsets = [0, 32], sizes = [2, 32], strides = [1, 1]} : vector<2x96xf32> to vector<2x32xf32>
    %25 = vector.extract_strided_slice %15 {offsets = [0, 32], sizes = [2, 32], strides = [1, 1]} : vector<2x96xf32> to vector<2x32xf32>
    %26 = arith.addf %24, %25 : vector<2x32xf32>
    %27 = arith.negf %26 : vector<2x32xf32>
    %28 = math.exp %27 : vector<2x32xf32>
    %cst_21 = arith.constant 1.000000e+00 : f32
    %29 = vector.broadcast %cst_21 : f32 to vector<2x32xf32>
    %30 = arith.addf %29, %28 : vector<2x32xf32>
    %31 = arith.divf %29, %30 : vector<2x32xf32>
    %32 = vector.extract_strided_slice %14 {offsets = [0, 64], sizes = [2, 32], strides = [1, 1]} : vector<2x96xf32> to vector<2x32xf32>
    %33 = vector.extract_strided_slice %15 {offsets = [0, 64], sizes = [2, 32], strides = [1, 1]} : vector<2x96xf32> to vector<2x32xf32>
    %34 = vector.broadcast %10 : vector<1x32xf32> to vector<2x32xf32>
    %35 = arith.addf %33, %34 : vector<2x32xf32>
    %36 = arith.mulf %23, %35 : vector<2x32xf32>
    %37 = arith.addf %32, %36 : vector<2x32xf32>
    %38 = math.tanh %37 : vector<2x32xf32>
    %cst_22 = arith.constant 1.000000e+00 : f32
    %39 = vector.broadcast %cst_22 : f32 to vector<2x32xf32>
    %40 = arith.subf %39, %31 : vector<2x32xf32>
    %41 = arith.mulf %40, %38 : vector<2x32xf32>
    %42 = arith.mulf %31, %12 : vector<2x32xf32>
    %43 = arith.addf %41, %42 : vector<2x32xf32>
    %cst_23 = arith.constant dense<0.000000e+00> : vector<2x96xf32>
    %44 = tpu.matmul %43, %6, %cst_23 {dimension_numbers = #tpu.dot_dimension_numbers<[1], [0], [0], [1], [0, 0, 1, 1], [], []>} : vector<2x32xf32>, vector<32x96xf32>, vector<2x96xf32> -> vector<2x96xf32>
    %45 = vector.broadcast %9 : vector<1x96xf32> to vector<2x96xf32>
    %46 = arith.addf %44, %45 : vector<2x96xf32>
    %cst_24 = arith.constant dense<0.000000e+00> : vector<2x96xf32>
    %47 = tpu.matmul %13, %8, %cst_24 {dimension_numbers = #tpu.dot_dimension_numbers<[1], [0], [0], [1], [0, 0, 1, 1], [], []>} : vector<2x32xf32>, vector<32x96xf32>, vector<2x96xf32> -> vector<2x96xf32>
    %48 = vector.extract_strided_slice %46 {offsets = [0, 0], sizes = [2, 32], strides = [1, 1]} : vector<2x96xf32> to vector<2x32xf32>
    %49 = vector.extract_strided_slice %47 {offsets = [0, 0], sizes = [2, 32], strides = [1, 1]} : vector<2x96xf32> to vector<2x32xf32>
    %50 = arith.addf %48, %49 : vector<2x32xf32>
    %51 = arith.negf %50 : vector<2x32xf32>
    %52 = math.exp %51 : vector<2x32xf32>
    %cst_25 = arith.constant 1.000000e+00 : f32
    %53 = vector.broadcast %cst_25 : f32 to vector<2x32xf32>
    %54 = arith.addf %53, %52 : vector<2x32xf32>
    %55 = arith.divf %53, %54 : vector<2x32xf32>
    %56 = vector.extract_strided_slice %46 {offsets = [0, 32], sizes = [2, 32], strides = [1, 1]} : vector<2x96xf32> to vector<2x32xf32>
    %57 = vector.extract_strided_slice %47 {offsets = [0, 32], sizes = [2, 32], strides = [1, 1]} : vector<2x96xf32> to vector<2x32xf32>
    %58 = arith.addf %56, %57 : vector<2x32xf32>
    %59 = arith.negf %58 : vector<2x32xf32>
    %60 = math.exp %59 : vector<2x32xf32>
    %cst_26 = arith.constant 1.000000e+00 : f32
    %61 = vector.broadcast %cst_26 : f32 to vector<2x32xf32>
    %62 = arith.addf %61, %60 : vector<2x32xf32>
    %63 = arith.divf %61, %62 : vector<2x32xf32>
    %64 = vector.extract_strided_slice %46 {offsets = [0, 64], sizes = [2, 32], strides = [1, 1]} : vector<2x96xf32> to vector<2x32xf32>
    %65 = vector.extract_strided_slice %47 {offsets = [0, 64], sizes = [2, 32], strides = [1, 1]} : vector<2x96xf32> to vector<2x32xf32>
    %66 = vector.broadcast %11 : vector<1x32xf32> to vector<2x32xf32>
    %67 = arith.addf %65, %66 : vector<2x32xf32>
    %68 = arith.mulf %55, %67 : vector<2x32xf32>
    %69 = arith.addf %64, %68 : vector<2x32xf32>
    %70 = math.tanh %69 : vector<2x32xf32>
    %cst_27 = arith.constant 1.000000e+00 : f32
    %71 = vector.broadcast %cst_27 : f32 to vector<2x32xf32>
    %72 = arith.subf %71, %63 : vector<2x32xf32>
    %73 = arith.mulf %72, %70 : vector<2x32xf32>
    %74 = arith.mulf %63, %13 : vector<2x32xf32>
    %75 = arith.addf %73, %74 : vector<2x32xf32>
    %76 = vector.extract_strided_slice %5 {offsets = [2, 0], sizes = [2, 96], strides = [1, 1]} : vector<16x96xf32> to vector<2x96xf32>
    %cst_28 = arith.constant dense<0.000000e+00> : vector<2x96xf32>
    %77 = tpu.matmul %43, %7, %cst_28 {dimension_numbers = #tpu.dot_dimension_numbers<[1], [0], [0], [1], [0, 0, 1, 1], [], []>} : vector<2x32xf32>, vector<32x96xf32>, vector<2x96xf32> -> vector<2x96xf32>
    %78 = vector.extract_strided_slice %76 {offsets = [0, 0], sizes = [2, 32], strides = [1, 1]} : vector<2x96xf32> to vector<2x32xf32>
    %79 = vector.extract_strided_slice %77 {offsets = [0, 0], sizes = [2, 32], strides = [1, 1]} : vector<2x96xf32> to vector<2x32xf32>
    %80 = arith.addf %78, %79 : vector<2x32xf32>
    %81 = arith.negf %80 : vector<2x32xf32>
    %82 = math.exp %81 : vector<2x32xf32>
    %cst_29 = arith.constant 1.000000e+00 : f32
    %83 = vector.broadcast %cst_29 : f32 to vector<2x32xf32>
    %84 = arith.addf %83, %82 : vector<2x32xf32>
    %85 = arith.divf %83, %84 : vector<2x32xf32>
    %86 = vector.extract_strided_slice %76 {offsets = [0, 32], sizes = [2, 32], strides = [1, 1]} : vector<2x96xf32> to vector<2x32xf32>
    %87 = vector.extract_strided_slice %77 {offsets = [0, 32], sizes = [2, 32], strides = [1, 1]} : vector<2x96xf32> to vector<2x32xf32>
    %88 = arith.addf %86, %87 : vector<2x32xf32>
    %89 = arith.negf %88 : vector<2x32xf32>
    %90 = math.exp %89 : vector<2x32xf32>
    %cst_30 = arith.constant 1.000000e+00 : f32
    %91 = vector.broadcast %cst_30 : f32 to vector<2x32xf32>
    %92 = arith.addf %91, %90 : vector<2x32xf32>
    %93 = arith.divf %91, %92 : vector<2x32xf32>
    %94 = vector.extract_strided_slice %76 {offsets = [0, 64], sizes = [2, 32], strides = [1, 1]} : vector<2x96xf32> to vector<2x32xf32>
    %95 = vector.extract_strided_slice %77 {offsets = [0, 64], sizes = [2, 32], strides = [1, 1]} : vector<2x96xf32> to vector<2x32xf32>
    %96 = vector.broadcast %10 : vector<1x32xf32> to vector<2x32xf32>
    %97 = arith.addf %95, %96 : vector<2x32xf32>
    %98 = arith.mulf %85, %97 : vector<2x32xf32>
    %99 = arith.addf %94, %98 : vector<2x32xf32>
    %100 = math.tanh %99 : vector<2x32xf32>
    %cst_31 = arith.constant 1.000000e+00 : f32
    %101 = vector.broadcast %cst_31 : f32 to vector<2x32xf32>
    %102 = arith.subf %101, %93 : vector<2x32xf32>
    %103 = arith.mulf %102, %100 : vector<2x32xf32>
    %104 = arith.mulf %93, %43 : vector<2x32xf32>
    %105 = arith.addf %103, %104 : vector<2x32xf32>
    %cst_32 = arith.constant dense<0.000000e+00> : vector<2x96xf32>
    %106 = tpu.matmul %105, %6, %cst_32 {dimension_numbers = #tpu.dot_dimension_numbers<[1], [0], [0], [1], [0, 0, 1, 1], [], []>} : vector<2x32xf32>, vector<32x96xf32>, vector<2x96xf32> -> vector<2x96xf32>
    %107 = vector.broadcast %9 : vector<1x96xf32> to vector<2x96xf32>
    %108 = arith.addf %106, %107 : vector<2x96xf32>
    %cst_33 = arith.constant dense<0.000000e+00> : vector<2x96xf32>
    %109 = tpu.matmul %75, %8, %cst_33 {dimension_numbers = #tpu.dot_dimension_numbers<[1], [0], [0], [1], [0, 0, 1, 1], [], []>} : vector<2x32xf32>, vector<32x96xf32>, vector<2x96xf32> -> vector<2x96xf32>
    %110 = vector.extract_strided_slice %108 {offsets = [0, 0], sizes = [2, 32], strides = [1, 1]} : vector<2x96xf32> to vector<2x32xf32>
    %111 = vector.extract_strided_slice %109 {offsets = [0, 0], sizes = [2, 32], strides = [1, 1]} : vector<2x96xf32> to vector<2x32xf32>
    %112 = arith.addf %110, %111 : vector<2x32xf32>
    %113 = arith.negf %112 : vector<2x32xf32>
    %114 = math.exp %113 : vector<2x32xf32>
    %cst_34 = arith.constant 1.000000e+00 : f32
    %115 = vector.broadcast %cst_34 : f32 to vector<2x32xf32>
    %116 = arith.addf %115, %114 : vector<2x32xf32>
    %117 = arith.divf %115, %116 : vector<2x32xf32>
    %118 = vector.extract_strided_slice %108 {offsets = [0, 32], sizes = [2, 32], strides = [1, 1]} : vector<2x96xf32> to vector<2x32xf32>
    %119 = vector.extract_strided_slice %109 {offsets = [0, 32], sizes = [2, 32], strides = [1, 1]} : vector<2x96xf32> to vector<2x32xf32>
    %120 = arith.addf %118, %119 : vector<2x32xf32>
    %121 = arith.negf %120 : vector<2x32xf32>
    %122 = math.exp %121 : vector<2x32xf32>
    %cst_35 = arith.constant 1.000000e+00 : f32
    %123 = vector.broadcast %cst_35 : f32 to vector<2x32xf32>
    %124 = arith.addf %123, %122 : vector<2x32xf32>
    %125 = arith.divf %123, %124 : vector<2x32xf32>
    %126 = vector.extract_strided_slice %108 {offsets = [0, 64], sizes = [2, 32], strides = [1, 1]} : vector<2x96xf32> to vector<2x32xf32>
    %127 = vector.extract_strided_slice %109 {offsets = [0, 64], sizes = [2, 32], strides = [1, 1]} : vector<2x96xf32> to vector<2x32xf32>
    %128 = vector.broadcast %11 : vector<1x32xf32> to vector<2x32xf32>
    %129 = arith.addf %127, %128 : vector<2x32xf32>
    %130 = arith.mulf %117, %129 : vector<2x32xf32>
    %131 = arith.addf %126, %130 : vector<2x32xf32>
    %132 = math.tanh %131 : vector<2x32xf32>
    %cst_36 = arith.constant 1.000000e+00 : f32
    %133 = vector.broadcast %cst_36 : f32 to vector<2x32xf32>
    %134 = arith.subf %133, %125 : vector<2x32xf32>
    %135 = arith.mulf %134, %132 : vector<2x32xf32>
    %136 = arith.mulf %125, %75 : vector<2x32xf32>
    %137 = arith.addf %135, %136 : vector<2x32xf32>
    %138 = vector.extract_strided_slice %5 {offsets = [4, 0], sizes = [2, 96], strides = [1, 1]} : vector<16x96xf32> to vector<2x96xf32>
    %cst_37 = arith.constant dense<0.000000e+00> : vector<2x96xf32>
    %139 = tpu.matmul %105, %7, %cst_37 {dimension_numbers = #tpu.dot_dimension_numbers<[1], [0], [0], [1], [0, 0, 1, 1], [], []>} : vector<2x32xf32>, vector<32x96xf32>, vector<2x96xf32> -> vector<2x96xf32>
    %140 = vector.extract_strided_slice %138 {offsets = [0, 0], sizes = [2, 32], strides = [1, 1]} : vector<2x96xf32> to vector<2x32xf32>
    %141 = vector.extract_strided_slice %139 {offsets = [0, 0], sizes = [2, 32], strides = [1, 1]} : vector<2x96xf32> to vector<2x32xf32>
    %142 = arith.addf %140, %141 : vector<2x32xf32>
    %143 = arith.negf %142 : vector<2x32xf32>
    %144 = math.exp %143 : vector<2x32xf32>
    %cst_38 = arith.constant 1.000000e+00 : f32
    %145 = vector.broadcast %cst_38 : f32 to vector<2x32xf32>
    %146 = arith.addf %145, %144 : vector<2x32xf32>
    %147 = arith.divf %145, %146 : vector<2x32xf32>
    %148 = vector.extract_strided_slice %138 {offsets = [0, 32], sizes = [2, 32], strides = [1, 1]} : vector<2x96xf32> to vector<2x32xf32>
    %149 = vector.extract_strided_slice %139 {offsets = [0, 32], sizes = [2, 32], strides = [1, 1]} : vector<2x96xf32> to vector<2x32xf32>
    %150 = arith.addf %148, %149 : vector<2x32xf32>
    %151 = arith.negf %150 : vector<2x32xf32>
    %152 = math.exp %151 : vector<2x32xf32>
    %cst_39 = arith.constant 1.000000e+00 : f32
    %153 = vector.broadcast %cst_39 : f32 to vector<2x32xf32>
    %154 = arith.addf %153, %152 : vector<2x32xf32>
    %155 = arith.divf %153, %154 : vector<2x32xf32>
    %156 = vector.extract_strided_slice %138 {offsets = [0, 64], sizes = [2, 32], strides = [1, 1]} : vector<2x96xf32> to vector<2x32xf32>
    %157 = vector.extract_strided_slice %139 {offsets = [0, 64], sizes = [2, 32], strides = [1, 1]} : vector<2x96xf32> to vector<2x32xf32>
    %158 = vector.broadcast %10 : vector<1x32xf32> to vector<2x32xf32>
    %159 = arith.addf %157, %158 : vector<2x32xf32>
    %160 = arith.mulf %147, %159 : vector<2x32xf32>
    %161 = arith.addf %156, %160 : vector<2x32xf32>
    %162 = math.tanh %161 : vector<2x32xf32>
    %cst_40 = arith.constant 1.000000e+00 : f32
    %163 = vector.broadcast %cst_40 : f32 to vector<2x32xf32>
    %164 = arith.subf %163, %155 : vector<2x32xf32>
    %165 = arith.mulf %164, %162 : vector<2x32xf32>
    %166 = arith.mulf %155, %105 : vector<2x32xf32>
    %167 = arith.addf %165, %166 : vector<2x32xf32>
    %cst_41 = arith.constant dense<0.000000e+00> : vector<2x96xf32>
    %168 = tpu.matmul %167, %6, %cst_41 {dimension_numbers = #tpu.dot_dimension_numbers<[1], [0], [0], [1], [0, 0, 1, 1], [], []>} : vector<2x32xf32>, vector<32x96xf32>, vector<2x96xf32> -> vector<2x96xf32>
    %169 = vector.broadcast %9 : vector<1x96xf32> to vector<2x96xf32>
    %170 = arith.addf %168, %169 : vector<2x96xf32>
    %cst_42 = arith.constant dense<0.000000e+00> : vector<2x96xf32>
    %171 = tpu.matmul %137, %8, %cst_42 {dimension_numbers = #tpu.dot_dimension_numbers<[1], [0], [0], [1], [0, 0, 1, 1], [], []>} : vector<2x32xf32>, vector<32x96xf32>, vector<2x96xf32> -> vector<2x96xf32>
    %172 = vector.extract_strided_slice %170 {offsets = [0, 0], sizes = [2, 32], strides = [1, 1]} : vector<2x96xf32> to vector<2x32xf32>
    %173 = vector.extract_strided_slice %171 {offsets = [0, 0], sizes = [2, 32], strides = [1, 1]} : vector<2x96xf32> to vector<2x32xf32>
    %174 = arith.addf %172, %173 : vector<2x32xf32>
    %175 = arith.negf %174 : vector<2x32xf32>
    %176 = math.exp %175 : vector<2x32xf32>
    %cst_43 = arith.constant 1.000000e+00 : f32
    %177 = vector.broadcast %cst_43 : f32 to vector<2x32xf32>
    %178 = arith.addf %177, %176 : vector<2x32xf32>
    %179 = arith.divf %177, %178 : vector<2x32xf32>
    %180 = vector.extract_strided_slice %170 {offsets = [0, 32], sizes = [2, 32], strides = [1, 1]} : vector<2x96xf32> to vector<2x32xf32>
    %181 = vector.extract_strided_slice %171 {offsets = [0, 32], sizes = [2, 32], strides = [1, 1]} : vector<2x96xf32> to vector<2x32xf32>
    %182 = arith.addf %180, %181 : vector<2x32xf32>
    %183 = arith.negf %182 : vector<2x32xf32>
    %184 = math.exp %183 : vector<2x32xf32>
    %cst_44 = arith.constant 1.000000e+00 : f32
    %185 = vector.broadcast %cst_44 : f32 to vector<2x32xf32>
    %186 = arith.addf %185, %184 : vector<2x32xf32>
    %187 = arith.divf %185, %186 : vector<2x32xf32>
    %188 = vector.extract_strided_slice %170 {offsets = [0, 64], sizes = [2, 32], strides = [1, 1]} : vector<2x96xf32> to vector<2x32xf32>
    %189 = vector.extract_strided_slice %171 {offsets = [0, 64], sizes = [2, 32], strides = [1, 1]} : vector<2x96xf32> to vector<2x32xf32>
    %190 = vector.broadcast %11 : vector<1x32xf32> to vector<2x32xf32>
    %191 = arith.addf %189, %190 : vector<2x32xf32>
    %192 = arith.mulf %179, %191 : vector<2x32xf32>
    %193 = arith.addf %188, %192 : vector<2x32xf32>
    %194 = math.tanh %193 : vector<2x32xf32>
    %cst_45 = arith.constant 1.000000e+00 : f32
    %195 = vector.broadcast %cst_45 : f32 to vector<2x32xf32>
    %196 = arith.subf %195, %187 : vector<2x32xf32>
    %197 = arith.mulf %196, %194 : vector<2x32xf32>
    %198 = arith.mulf %187, %137 : vector<2x32xf32>
    %199 = arith.addf %197, %198 : vector<2x32xf32>
    %200 = vector.extract_strided_slice %5 {offsets = [6, 0], sizes = [2, 96], strides = [1, 1]} : vector<16x96xf32> to vector<2x96xf32>
    %cst_46 = arith.constant dense<0.000000e+00> : vector<2x96xf32>
    %201 = tpu.matmul %167, %7, %cst_46 {dimension_numbers = #tpu.dot_dimension_numbers<[1], [0], [0], [1], [0, 0, 1, 1], [], []>} : vector<2x32xf32>, vector<32x96xf32>, vector<2x96xf32> -> vector<2x96xf32>
    %202 = vector.extract_strided_slice %200 {offsets = [0, 0], sizes = [2, 32], strides = [1, 1]} : vector<2x96xf32> to vector<2x32xf32>
    %203 = vector.extract_strided_slice %201 {offsets = [0, 0], sizes = [2, 32], strides = [1, 1]} : vector<2x96xf32> to vector<2x32xf32>
    %204 = arith.addf %202, %203 : vector<2x32xf32>
    %205 = arith.negf %204 : vector<2x32xf32>
    %206 = math.exp %205 : vector<2x32xf32>
    %cst_47 = arith.constant 1.000000e+00 : f32
    %207 = vector.broadcast %cst_47 : f32 to vector<2x32xf32>
    %208 = arith.addf %207, %206 : vector<2x32xf32>
    %209 = arith.divf %207, %208 : vector<2x32xf32>
    %210 = vector.extract_strided_slice %200 {offsets = [0, 32], sizes = [2, 32], strides = [1, 1]} : vector<2x96xf32> to vector<2x32xf32>
    %211 = vector.extract_strided_slice %201 {offsets = [0, 32], sizes = [2, 32], strides = [1, 1]} : vector<2x96xf32> to vector<2x32xf32>
    %212 = arith.addf %210, %211 : vector<2x32xf32>
    %213 = arith.negf %212 : vector<2x32xf32>
    %214 = math.exp %213 : vector<2x32xf32>
    %cst_48 = arith.constant 1.000000e+00 : f32
    %215 = vector.broadcast %cst_48 : f32 to vector<2x32xf32>
    %216 = arith.addf %215, %214 : vector<2x32xf32>
    %217 = arith.divf %215, %216 : vector<2x32xf32>
    %218 = vector.extract_strided_slice %200 {offsets = [0, 64], sizes = [2, 32], strides = [1, 1]} : vector<2x96xf32> to vector<2x32xf32>
    %219 = vector.extract_strided_slice %201 {offsets = [0, 64], sizes = [2, 32], strides = [1, 1]} : vector<2x96xf32> to vector<2x32xf32>
    %220 = vector.broadcast %10 : vector<1x32xf32> to vector<2x32xf32>
    %221 = arith.addf %219, %220 : vector<2x32xf32>
    %222 = arith.mulf %209, %221 : vector<2x32xf32>
    %223 = arith.addf %218, %222 : vector<2x32xf32>
    %224 = math.tanh %223 : vector<2x32xf32>
    %cst_49 = arith.constant 1.000000e+00 : f32
    %225 = vector.broadcast %cst_49 : f32 to vector<2x32xf32>
    %226 = arith.subf %225, %217 : vector<2x32xf32>
    %227 = arith.mulf %226, %224 : vector<2x32xf32>
    %228 = arith.mulf %217, %167 : vector<2x32xf32>
    %229 = arith.addf %227, %228 : vector<2x32xf32>
    %cst_50 = arith.constant dense<0.000000e+00> : vector<2x96xf32>
    %230 = tpu.matmul %229, %6, %cst_50 {dimension_numbers = #tpu.dot_dimension_numbers<[1], [0], [0], [1], [0, 0, 1, 1], [], []>} : vector<2x32xf32>, vector<32x96xf32>, vector<2x96xf32> -> vector<2x96xf32>
    %231 = vector.broadcast %9 : vector<1x96xf32> to vector<2x96xf32>
    %232 = arith.addf %230, %231 : vector<2x96xf32>
    %cst_51 = arith.constant dense<0.000000e+00> : vector<2x96xf32>
    %233 = tpu.matmul %199, %8, %cst_51 {dimension_numbers = #tpu.dot_dimension_numbers<[1], [0], [0], [1], [0, 0, 1, 1], [], []>} : vector<2x32xf32>, vector<32x96xf32>, vector<2x96xf32> -> vector<2x96xf32>
    %234 = vector.extract_strided_slice %232 {offsets = [0, 0], sizes = [2, 32], strides = [1, 1]} : vector<2x96xf32> to vector<2x32xf32>
    %235 = vector.extract_strided_slice %233 {offsets = [0, 0], sizes = [2, 32], strides = [1, 1]} : vector<2x96xf32> to vector<2x32xf32>
    %236 = arith.addf %234, %235 : vector<2x32xf32>
    %237 = arith.negf %236 : vector<2x32xf32>
    %238 = math.exp %237 : vector<2x32xf32>
    %cst_52 = arith.constant 1.000000e+00 : f32
    %239 = vector.broadcast %cst_52 : f32 to vector<2x32xf32>
    %240 = arith.addf %239, %238 : vector<2x32xf32>
    %241 = arith.divf %239, %240 : vector<2x32xf32>
    %242 = vector.extract_strided_slice %232 {offsets = [0, 32], sizes = [2, 32], strides = [1, 1]} : vector<2x96xf32> to vector<2x32xf32>
    %243 = vector.extract_strided_slice %233 {offsets = [0, 32], sizes = [2, 32], strides = [1, 1]} : vector<2x96xf32> to vector<2x32xf32>
    %244 = arith.addf %242, %243 : vector<2x32xf32>
    %245 = arith.negf %244 : vector<2x32xf32>
    %246 = math.exp %245 : vector<2x32xf32>
    %cst_53 = arith.constant 1.000000e+00 : f32
    %247 = vector.broadcast %cst_53 : f32 to vector<2x32xf32>
    %248 = arith.addf %247, %246 : vector<2x32xf32>
    %249 = arith.divf %247, %248 : vector<2x32xf32>
    %250 = vector.extract_strided_slice %232 {offsets = [0, 64], sizes = [2, 32], strides = [1, 1]} : vector<2x96xf32> to vector<2x32xf32>
    %251 = vector.extract_strided_slice %233 {offsets = [0, 64], sizes = [2, 32], strides = [1, 1]} : vector<2x96xf32> to vector<2x32xf32>
    %252 = vector.broadcast %11 : vector<1x32xf32> to vector<2x32xf32>
    %253 = arith.addf %251, %252 : vector<2x32xf32>
    %254 = arith.mulf %241, %253 : vector<2x32xf32>
    %255 = arith.addf %250, %254 : vector<2x32xf32>
    %256 = math.tanh %255 : vector<2x32xf32>
    %cst_54 = arith.constant 1.000000e+00 : f32
    %257 = vector.broadcast %cst_54 : f32 to vector<2x32xf32>
    %258 = arith.subf %257, %249 : vector<2x32xf32>
    %259 = arith.mulf %258, %256 : vector<2x32xf32>
    %260 = arith.mulf %249, %199 : vector<2x32xf32>
    %261 = arith.addf %259, %260 : vector<2x32xf32>
    %262 = vector.extract_strided_slice %5 {offsets = [8, 0], sizes = [2, 96], strides = [1, 1]} : vector<16x96xf32> to vector<2x96xf32>
    %cst_55 = arith.constant dense<0.000000e+00> : vector<2x96xf32>
    %263 = tpu.matmul %229, %7, %cst_55 {dimension_numbers = #tpu.dot_dimension_numbers<[1], [0], [0], [1], [0, 0, 1, 1], [], []>} : vector<2x32xf32>, vector<32x96xf32>, vector<2x96xf32> -> vector<2x96xf32>
    %264 = vector.extract_strided_slice %262 {offsets = [0, 0], sizes = [2, 32], strides = [1, 1]} : vector<2x96xf32> to vector<2x32xf32>
    %265 = vector.extract_strided_slice %263 {offsets = [0, 0], sizes = [2, 32], strides = [1, 1]} : vector<2x96xf32> to vector<2x32xf32>
    %266 = arith.addf %264, %265 : vector<2x32xf32>
    %267 = arith.negf %266 : vector<2x32xf32>
    %268 = math.exp %267 : vector<2x32xf32>
    %cst_56 = arith.constant 1.000000e+00 : f32
    %269 = vector.broadcast %cst_56 : f32 to vector<2x32xf32>
    %270 = arith.addf %269, %268 : vector<2x32xf32>
    %271 = arith.divf %269, %270 : vector<2x32xf32>
    %272 = vector.extract_strided_slice %262 {offsets = [0, 32], sizes = [2, 32], strides = [1, 1]} : vector<2x96xf32> to vector<2x32xf32>
    %273 = vector.extract_strided_slice %263 {offsets = [0, 32], sizes = [2, 32], strides = [1, 1]} : vector<2x96xf32> to vector<2x32xf32>
    %274 = arith.addf %272, %273 : vector<2x32xf32>
    %275 = arith.negf %274 : vector<2x32xf32>
    %276 = math.exp %275 : vector<2x32xf32>
    %cst_57 = arith.constant 1.000000e+00 : f32
    %277 = vector.broadcast %cst_57 : f32 to vector<2x32xf32>
    %278 = arith.addf %277, %276 : vector<2x32xf32>
    %279 = arith.divf %277, %278 : vector<2x32xf32>
    %280 = vector.extract_strided_slice %262 {offsets = [0, 64], sizes = [2, 32], strides = [1, 1]} : vector<2x96xf32> to vector<2x32xf32>
    %281 = vector.extract_strided_slice %263 {offsets = [0, 64], sizes = [2, 32], strides = [1, 1]} : vector<2x96xf32> to vector<2x32xf32>
    %282 = vector.broadcast %10 : vector<1x32xf32> to vector<2x32xf32>
    %283 = arith.addf %281, %282 : vector<2x32xf32>
    %284 = arith.mulf %271, %283 : vector<2x32xf32>
    %285 = arith.addf %280, %284 : vector<2x32xf32>
    %286 = math.tanh %285 : vector<2x32xf32>
    %cst_58 = arith.constant 1.000000e+00 : f32
    %287 = vector.broadcast %cst_58 : f32 to vector<2x32xf32>
    %288 = arith.subf %287, %279 : vector<2x32xf32>
    %289 = arith.mulf %288, %286 : vector<2x32xf32>
    %290 = arith.mulf %279, %229 : vector<2x32xf32>
    %291 = arith.addf %289, %290 : vector<2x32xf32>
    %cst_59 = arith.constant dense<0.000000e+00> : vector<2x96xf32>
    %292 = tpu.matmul %291, %6, %cst_59 {dimension_numbers = #tpu.dot_dimension_numbers<[1], [0], [0], [1], [0, 0, 1, 1], [], []>} : vector<2x32xf32>, vector<32x96xf32>, vector<2x96xf32> -> vector<2x96xf32>
    %293 = vector.broadcast %9 : vector<1x96xf32> to vector<2x96xf32>
    %294 = arith.addf %292, %293 : vector<2x96xf32>
    %cst_60 = arith.constant dense<0.000000e+00> : vector<2x96xf32>
    %295 = tpu.matmul %261, %8, %cst_60 {dimension_numbers = #tpu.dot_dimension_numbers<[1], [0], [0], [1], [0, 0, 1, 1], [], []>} : vector<2x32xf32>, vector<32x96xf32>, vector<2x96xf32> -> vector<2x96xf32>
    %296 = vector.extract_strided_slice %294 {offsets = [0, 0], sizes = [2, 32], strides = [1, 1]} : vector<2x96xf32> to vector<2x32xf32>
    %297 = vector.extract_strided_slice %295 {offsets = [0, 0], sizes = [2, 32], strides = [1, 1]} : vector<2x96xf32> to vector<2x32xf32>
    %298 = arith.addf %296, %297 : vector<2x32xf32>
    %299 = arith.negf %298 : vector<2x32xf32>
    %300 = math.exp %299 : vector<2x32xf32>
    %cst_61 = arith.constant 1.000000e+00 : f32
    %301 = vector.broadcast %cst_61 : f32 to vector<2x32xf32>
    %302 = arith.addf %301, %300 : vector<2x32xf32>
    %303 = arith.divf %301, %302 : vector<2x32xf32>
    %304 = vector.extract_strided_slice %294 {offsets = [0, 32], sizes = [2, 32], strides = [1, 1]} : vector<2x96xf32> to vector<2x32xf32>
    %305 = vector.extract_strided_slice %295 {offsets = [0, 32], sizes = [2, 32], strides = [1, 1]} : vector<2x96xf32> to vector<2x32xf32>
    %306 = arith.addf %304, %305 : vector<2x32xf32>
    %307 = arith.negf %306 : vector<2x32xf32>
    %308 = math.exp %307 : vector<2x32xf32>
    %cst_62 = arith.constant 1.000000e+00 : f32
    %309 = vector.broadcast %cst_62 : f32 to vector<2x32xf32>
    %310 = arith.addf %309, %308 : vector<2x32xf32>
    %311 = arith.divf %309, %310 : vector<2x32xf32>
    %312 = vector.extract_strided_slice %294 {offsets = [0, 64], sizes = [2, 32], strides = [1, 1]} : vector<2x96xf32> to vector<2x32xf32>
    %313 = vector.extract_strided_slice %295 {offsets = [0, 64], sizes = [2, 32], strides = [1, 1]} : vector<2x96xf32> to vector<2x32xf32>
    %314 = vector.broadcast %11 : vector<1x32xf32> to vector<2x32xf32>
    %315 = arith.addf %313, %314 : vector<2x32xf32>
    %316 = arith.mulf %303, %315 : vector<2x32xf32>
    %317 = arith.addf %312, %316 : vector<2x32xf32>
    %318 = math.tanh %317 : vector<2x32xf32>
    %cst_63 = arith.constant 1.000000e+00 : f32
    %319 = vector.broadcast %cst_63 : f32 to vector<2x32xf32>
    %320 = arith.subf %319, %311 : vector<2x32xf32>
    %321 = arith.mulf %320, %318 : vector<2x32xf32>
    %322 = arith.mulf %311, %261 : vector<2x32xf32>
    %323 = arith.addf %321, %322 : vector<2x32xf32>
    %324 = vector.extract_strided_slice %5 {offsets = [10, 0], sizes = [2, 96], strides = [1, 1]} : vector<16x96xf32> to vector<2x96xf32>
    %cst_64 = arith.constant dense<0.000000e+00> : vector<2x96xf32>
    %325 = tpu.matmul %291, %7, %cst_64 {dimension_numbers = #tpu.dot_dimension_numbers<[1], [0], [0], [1], [0, 0, 1, 1], [], []>} : vector<2x32xf32>, vector<32x96xf32>, vector<2x96xf32> -> vector<2x96xf32>
    %326 = vector.extract_strided_slice %324 {offsets = [0, 0], sizes = [2, 32], strides = [1, 1]} : vector<2x96xf32> to vector<2x32xf32>
    %327 = vector.extract_strided_slice %325 {offsets = [0, 0], sizes = [2, 32], strides = [1, 1]} : vector<2x96xf32> to vector<2x32xf32>
    %328 = arith.addf %326, %327 : vector<2x32xf32>
    %329 = arith.negf %328 : vector<2x32xf32>
    %330 = math.exp %329 : vector<2x32xf32>
    %cst_65 = arith.constant 1.000000e+00 : f32
    %331 = vector.broadcast %cst_65 : f32 to vector<2x32xf32>
    %332 = arith.addf %331, %330 : vector<2x32xf32>
    %333 = arith.divf %331, %332 : vector<2x32xf32>
    %334 = vector.extract_strided_slice %324 {offsets = [0, 32], sizes = [2, 32], strides = [1, 1]} : vector<2x96xf32> to vector<2x32xf32>
    %335 = vector.extract_strided_slice %325 {offsets = [0, 32], sizes = [2, 32], strides = [1, 1]} : vector<2x96xf32> to vector<2x32xf32>
    %336 = arith.addf %334, %335 : vector<2x32xf32>
    %337 = arith.negf %336 : vector<2x32xf32>
    %338 = math.exp %337 : vector<2x32xf32>
    %cst_66 = arith.constant 1.000000e+00 : f32
    %339 = vector.broadcast %cst_66 : f32 to vector<2x32xf32>
    %340 = arith.addf %339, %338 : vector<2x32xf32>
    %341 = arith.divf %339, %340 : vector<2x32xf32>
    %342 = vector.extract_strided_slice %324 {offsets = [0, 64], sizes = [2, 32], strides = [1, 1]} : vector<2x96xf32> to vector<2x32xf32>
    %343 = vector.extract_strided_slice %325 {offsets = [0, 64], sizes = [2, 32], strides = [1, 1]} : vector<2x96xf32> to vector<2x32xf32>
    %344 = vector.broadcast %10 : vector<1x32xf32> to vector<2x32xf32>
    %345 = arith.addf %343, %344 : vector<2x32xf32>
    %346 = arith.mulf %333, %345 : vector<2x32xf32>
    %347 = arith.addf %342, %346 : vector<2x32xf32>
    %348 = math.tanh %347 : vector<2x32xf32>
    %cst_67 = arith.constant 1.000000e+00 : f32
    %349 = vector.broadcast %cst_67 : f32 to vector<2x32xf32>
    %350 = arith.subf %349, %341 : vector<2x32xf32>
    %351 = arith.mulf %350, %348 : vector<2x32xf32>
    %352 = arith.mulf %341, %291 : vector<2x32xf32>
    %353 = arith.addf %351, %352 : vector<2x32xf32>
    %cst_68 = arith.constant dense<0.000000e+00> : vector<2x96xf32>
    %354 = tpu.matmul %353, %6, %cst_68 {dimension_numbers = #tpu.dot_dimension_numbers<[1], [0], [0], [1], [0, 0, 1, 1], [], []>} : vector<2x32xf32>, vector<32x96xf32>, vector<2x96xf32> -> vector<2x96xf32>
    %355 = vector.broadcast %9 : vector<1x96xf32> to vector<2x96xf32>
    %356 = arith.addf %354, %355 : vector<2x96xf32>
    %cst_69 = arith.constant dense<0.000000e+00> : vector<2x96xf32>
    %357 = tpu.matmul %323, %8, %cst_69 {dimension_numbers = #tpu.dot_dimension_numbers<[1], [0], [0], [1], [0, 0, 1, 1], [], []>} : vector<2x32xf32>, vector<32x96xf32>, vector<2x96xf32> -> vector<2x96xf32>
    %358 = vector.extract_strided_slice %356 {offsets = [0, 0], sizes = [2, 32], strides = [1, 1]} : vector<2x96xf32> to vector<2x32xf32>
    %359 = vector.extract_strided_slice %357 {offsets = [0, 0], sizes = [2, 32], strides = [1, 1]} : vector<2x96xf32> to vector<2x32xf32>
    %360 = arith.addf %358, %359 : vector<2x32xf32>
    %361 = arith.negf %360 : vector<2x32xf32>
    %362 = math.exp %361 : vector<2x32xf32>
    %cst_70 = arith.constant 1.000000e+00 : f32
    %363 = vector.broadcast %cst_70 : f32 to vector<2x32xf32>
    %364 = arith.addf %363, %362 : vector<2x32xf32>
    %365 = arith.divf %363, %364 : vector<2x32xf32>
    %366 = vector.extract_strided_slice %356 {offsets = [0, 32], sizes = [2, 32], strides = [1, 1]} : vector<2x96xf32> to vector<2x32xf32>
    %367 = vector.extract_strided_slice %357 {offsets = [0, 32], sizes = [2, 32], strides = [1, 1]} : vector<2x96xf32> to vector<2x32xf32>
    %368 = arith.addf %366, %367 : vector<2x32xf32>
    %369 = arith.negf %368 : vector<2x32xf32>
    %370 = math.exp %369 : vector<2x32xf32>
    %cst_71 = arith.constant 1.000000e+00 : f32
    %371 = vector.broadcast %cst_71 : f32 to vector<2x32xf32>
    %372 = arith.addf %371, %370 : vector<2x32xf32>
    %373 = arith.divf %371, %372 : vector<2x32xf32>
    %374 = vector.extract_strided_slice %356 {offsets = [0, 64], sizes = [2, 32], strides = [1, 1]} : vector<2x96xf32> to vector<2x32xf32>
    %375 = vector.extract_strided_slice %357 {offsets = [0, 64], sizes = [2, 32], strides = [1, 1]} : vector<2x96xf32> to vector<2x32xf32>
    %376 = vector.broadcast %11 : vector<1x32xf32> to vector<2x32xf32>
    %377 = arith.addf %375, %376 : vector<2x32xf32>
    %378 = arith.mulf %365, %377 : vector<2x32xf32>
    %379 = arith.addf %374, %378 : vector<2x32xf32>
    %380 = math.tanh %379 : vector<2x32xf32>
    %cst_72 = arith.constant 1.000000e+00 : f32
    %381 = vector.broadcast %cst_72 : f32 to vector<2x32xf32>
    %382 = arith.subf %381, %373 : vector<2x32xf32>
    %383 = arith.mulf %382, %380 : vector<2x32xf32>
    %384 = arith.mulf %373, %323 : vector<2x32xf32>
    %385 = arith.addf %383, %384 : vector<2x32xf32>
    %386 = vector.extract_strided_slice %5 {offsets = [12, 0], sizes = [2, 96], strides = [1, 1]} : vector<16x96xf32> to vector<2x96xf32>
    %cst_73 = arith.constant dense<0.000000e+00> : vector<2x96xf32>
    %387 = tpu.matmul %353, %7, %cst_73 {dimension_numbers = #tpu.dot_dimension_numbers<[1], [0], [0], [1], [0, 0, 1, 1], [], []>} : vector<2x32xf32>, vector<32x96xf32>, vector<2x96xf32> -> vector<2x96xf32>
    %388 = vector.extract_strided_slice %386 {offsets = [0, 0], sizes = [2, 32], strides = [1, 1]} : vector<2x96xf32> to vector<2x32xf32>
    %389 = vector.extract_strided_slice %387 {offsets = [0, 0], sizes = [2, 32], strides = [1, 1]} : vector<2x96xf32> to vector<2x32xf32>
    %390 = arith.addf %388, %389 : vector<2x32xf32>
    %391 = arith.negf %390 : vector<2x32xf32>
    %392 = math.exp %391 : vector<2x32xf32>
    %cst_74 = arith.constant 1.000000e+00 : f32
    %393 = vector.broadcast %cst_74 : f32 to vector<2x32xf32>
    %394 = arith.addf %393, %392 : vector<2x32xf32>
    %395 = arith.divf %393, %394 : vector<2x32xf32>
    %396 = vector.extract_strided_slice %386 {offsets = [0, 32], sizes = [2, 32], strides = [1, 1]} : vector<2x96xf32> to vector<2x32xf32>
    %397 = vector.extract_strided_slice %387 {offsets = [0, 32], sizes = [2, 32], strides = [1, 1]} : vector<2x96xf32> to vector<2x32xf32>
    %398 = arith.addf %396, %397 : vector<2x32xf32>
    %399 = arith.negf %398 : vector<2x32xf32>
    %400 = math.exp %399 : vector<2x32xf32>
    %cst_75 = arith.constant 1.000000e+00 : f32
    %401 = vector.broadcast %cst_75 : f32 to vector<2x32xf32>
    %402 = arith.addf %401, %400 : vector<2x32xf32>
    %403 = arith.divf %401, %402 : vector<2x32xf32>
    %404 = vector.extract_strided_slice %386 {offsets = [0, 64], sizes = [2, 32], strides = [1, 1]} : vector<2x96xf32> to vector<2x32xf32>
    %405 = vector.extract_strided_slice %387 {offsets = [0, 64], sizes = [2, 32], strides = [1, 1]} : vector<2x96xf32> to vector<2x32xf32>
    %406 = vector.broadcast %10 : vector<1x32xf32> to vector<2x32xf32>
    %407 = arith.addf %405, %406 : vector<2x32xf32>
    %408 = arith.mulf %395, %407 : vector<2x32xf32>
    %409 = arith.addf %404, %408 : vector<2x32xf32>
    %410 = math.tanh %409 : vector<2x32xf32>
    %cst_76 = arith.constant 1.000000e+00 : f32
    %411 = vector.broadcast %cst_76 : f32 to vector<2x32xf32>
    %412 = arith.subf %411, %403 : vector<2x32xf32>
    %413 = arith.mulf %412, %410 : vector<2x32xf32>
    %414 = arith.mulf %403, %353 : vector<2x32xf32>
    %415 = arith.addf %413, %414 : vector<2x32xf32>
    %cst_77 = arith.constant dense<0.000000e+00> : vector<2x96xf32>
    %416 = tpu.matmul %415, %6, %cst_77 {dimension_numbers = #tpu.dot_dimension_numbers<[1], [0], [0], [1], [0, 0, 1, 1], [], []>} : vector<2x32xf32>, vector<32x96xf32>, vector<2x96xf32> -> vector<2x96xf32>
    %417 = vector.broadcast %9 : vector<1x96xf32> to vector<2x96xf32>
    %418 = arith.addf %416, %417 : vector<2x96xf32>
    %cst_78 = arith.constant dense<0.000000e+00> : vector<2x96xf32>
    %419 = tpu.matmul %385, %8, %cst_78 {dimension_numbers = #tpu.dot_dimension_numbers<[1], [0], [0], [1], [0, 0, 1, 1], [], []>} : vector<2x32xf32>, vector<32x96xf32>, vector<2x96xf32> -> vector<2x96xf32>
    %420 = vector.extract_strided_slice %418 {offsets = [0, 0], sizes = [2, 32], strides = [1, 1]} : vector<2x96xf32> to vector<2x32xf32>
    %421 = vector.extract_strided_slice %419 {offsets = [0, 0], sizes = [2, 32], strides = [1, 1]} : vector<2x96xf32> to vector<2x32xf32>
    %422 = arith.addf %420, %421 : vector<2x32xf32>
    %423 = arith.negf %422 : vector<2x32xf32>
    %424 = math.exp %423 : vector<2x32xf32>
    %cst_79 = arith.constant 1.000000e+00 : f32
    %425 = vector.broadcast %cst_79 : f32 to vector<2x32xf32>
    %426 = arith.addf %425, %424 : vector<2x32xf32>
    %427 = arith.divf %425, %426 : vector<2x32xf32>
    %428 = vector.extract_strided_slice %418 {offsets = [0, 32], sizes = [2, 32], strides = [1, 1]} : vector<2x96xf32> to vector<2x32xf32>
    %429 = vector.extract_strided_slice %419 {offsets = [0, 32], sizes = [2, 32], strides = [1, 1]} : vector<2x96xf32> to vector<2x32xf32>
    %430 = arith.addf %428, %429 : vector<2x32xf32>
    %431 = arith.negf %430 : vector<2x32xf32>
    %432 = math.exp %431 : vector<2x32xf32>
    %cst_80 = arith.constant 1.000000e+00 : f32
    %433 = vector.broadcast %cst_80 : f32 to vector<2x32xf32>
    %434 = arith.addf %433, %432 : vector<2x32xf32>
    %435 = arith.divf %433, %434 : vector<2x32xf32>
    %436 = vector.extract_strided_slice %418 {offsets = [0, 64], sizes = [2, 32], strides = [1, 1]} : vector<2x96xf32> to vector<2x32xf32>
    %437 = vector.extract_strided_slice %419 {offsets = [0, 64], sizes = [2, 32], strides = [1, 1]} : vector<2x96xf32> to vector<2x32xf32>
    %438 = vector.broadcast %11 : vector<1x32xf32> to vector<2x32xf32>
    %439 = arith.addf %437, %438 : vector<2x32xf32>
    %440 = arith.mulf %427, %439 : vector<2x32xf32>
    %441 = arith.addf %436, %440 : vector<2x32xf32>
    %442 = math.tanh %441 : vector<2x32xf32>
    %cst_81 = arith.constant 1.000000e+00 : f32
    %443 = vector.broadcast %cst_81 : f32 to vector<2x32xf32>
    %444 = arith.subf %443, %435 : vector<2x32xf32>
    %445 = arith.mulf %444, %442 : vector<2x32xf32>
    %446 = arith.mulf %435, %385 : vector<2x32xf32>
    %447 = arith.addf %445, %446 : vector<2x32xf32>
    %448 = vector.extract_strided_slice %5 {offsets = [14, 0], sizes = [2, 96], strides = [1, 1]} : vector<16x96xf32> to vector<2x96xf32>
    %cst_82 = arith.constant dense<0.000000e+00> : vector<2x96xf32>
    %449 = tpu.matmul %415, %7, %cst_82 {dimension_numbers = #tpu.dot_dimension_numbers<[1], [0], [0], [1], [0, 0, 1, 1], [], []>} : vector<2x32xf32>, vector<32x96xf32>, vector<2x96xf32> -> vector<2x96xf32>
    %450 = vector.extract_strided_slice %448 {offsets = [0, 0], sizes = [2, 32], strides = [1, 1]} : vector<2x96xf32> to vector<2x32xf32>
    %451 = vector.extract_strided_slice %449 {offsets = [0, 0], sizes = [2, 32], strides = [1, 1]} : vector<2x96xf32> to vector<2x32xf32>
    %452 = arith.addf %450, %451 : vector<2x32xf32>
    %453 = arith.negf %452 : vector<2x32xf32>
    %454 = math.exp %453 : vector<2x32xf32>
    %cst_83 = arith.constant 1.000000e+00 : f32
    %455 = vector.broadcast %cst_83 : f32 to vector<2x32xf32>
    %456 = arith.addf %455, %454 : vector<2x32xf32>
    %457 = arith.divf %455, %456 : vector<2x32xf32>
    %458 = vector.extract_strided_slice %448 {offsets = [0, 32], sizes = [2, 32], strides = [1, 1]} : vector<2x96xf32> to vector<2x32xf32>
    %459 = vector.extract_strided_slice %449 {offsets = [0, 32], sizes = [2, 32], strides = [1, 1]} : vector<2x96xf32> to vector<2x32xf32>
    %460 = arith.addf %458, %459 : vector<2x32xf32>
    %461 = arith.negf %460 : vector<2x32xf32>
    %462 = math.exp %461 : vector<2x32xf32>
    %cst_84 = arith.constant 1.000000e+00 : f32
    %463 = vector.broadcast %cst_84 : f32 to vector<2x32xf32>
    %464 = arith.addf %463, %462 : vector<2x32xf32>
    %465 = arith.divf %463, %464 : vector<2x32xf32>
    %466 = vector.extract_strided_slice %448 {offsets = [0, 64], sizes = [2, 32], strides = [1, 1]} : vector<2x96xf32> to vector<2x32xf32>
    %467 = vector.extract_strided_slice %449 {offsets = [0, 64], sizes = [2, 32], strides = [1, 1]} : vector<2x96xf32> to vector<2x32xf32>
    %468 = vector.broadcast %10 : vector<1x32xf32> to vector<2x32xf32>
    %469 = arith.addf %467, %468 : vector<2x32xf32>
    %470 = arith.mulf %457, %469 : vector<2x32xf32>
    %471 = arith.addf %466, %470 : vector<2x32xf32>
    %472 = math.tanh %471 : vector<2x32xf32>
    %cst_85 = arith.constant 1.000000e+00 : f32
    %473 = vector.broadcast %cst_85 : f32 to vector<2x32xf32>
    %474 = arith.subf %473, %465 : vector<2x32xf32>
    %475 = arith.mulf %474, %472 : vector<2x32xf32>
    %476 = arith.mulf %465, %415 : vector<2x32xf32>
    %477 = arith.addf %475, %476 : vector<2x32xf32>
    %cst_86 = arith.constant dense<0.000000e+00> : vector<2x96xf32>
    %478 = tpu.matmul %477, %6, %cst_86 {dimension_numbers = #tpu.dot_dimension_numbers<[1], [0], [0], [1], [0, 0, 1, 1], [], []>} : vector<2x32xf32>, vector<32x96xf32>, vector<2x96xf32> -> vector<2x96xf32>
    %479 = vector.broadcast %9 : vector<1x96xf32> to vector<2x96xf32>
    %480 = arith.addf %478, %479 : vector<2x96xf32>
    %cst_87 = arith.constant dense<0.000000e+00> : vector<2x96xf32>
    %481 = tpu.matmul %447, %8, %cst_87 {dimension_numbers = #tpu.dot_dimension_numbers<[1], [0], [0], [1], [0, 0, 1, 1], [], []>} : vector<2x32xf32>, vector<32x96xf32>, vector<2x96xf32> -> vector<2x96xf32>
    %482 = vector.extract_strided_slice %480 {offsets = [0, 0], sizes = [2, 32], strides = [1, 1]} : vector<2x96xf32> to vector<2x32xf32>
    %483 = vector.extract_strided_slice %481 {offsets = [0, 0], sizes = [2, 32], strides = [1, 1]} : vector<2x96xf32> to vector<2x32xf32>
    %484 = arith.addf %482, %483 : vector<2x32xf32>
    %485 = arith.negf %484 : vector<2x32xf32>
    %486 = math.exp %485 : vector<2x32xf32>
    %cst_88 = arith.constant 1.000000e+00 : f32
    %487 = vector.broadcast %cst_88 : f32 to vector<2x32xf32>
    %488 = arith.addf %487, %486 : vector<2x32xf32>
    %489 = arith.divf %487, %488 : vector<2x32xf32>
    %490 = vector.extract_strided_slice %480 {offsets = [0, 32], sizes = [2, 32], strides = [1, 1]} : vector<2x96xf32> to vector<2x32xf32>
    %491 = vector.extract_strided_slice %481 {offsets = [0, 32], sizes = [2, 32], strides = [1, 1]} : vector<2x96xf32> to vector<2x32xf32>
    %492 = arith.addf %490, %491 : vector<2x32xf32>
    %493 = arith.negf %492 : vector<2x32xf32>
    %494 = math.exp %493 : vector<2x32xf32>
    %cst_89 = arith.constant 1.000000e+00 : f32
    %495 = vector.broadcast %cst_89 : f32 to vector<2x32xf32>
    %496 = arith.addf %495, %494 : vector<2x32xf32>
    %497 = arith.divf %495, %496 : vector<2x32xf32>
    %498 = vector.extract_strided_slice %480 {offsets = [0, 64], sizes = [2, 32], strides = [1, 1]} : vector<2x96xf32> to vector<2x32xf32>
    %499 = vector.extract_strided_slice %481 {offsets = [0, 64], sizes = [2, 32], strides = [1, 1]} : vector<2x96xf32> to vector<2x32xf32>
    %500 = vector.broadcast %11 : vector<1x32xf32> to vector<2x32xf32>
    %501 = arith.addf %499, %500 : vector<2x32xf32>
    %502 = arith.mulf %489, %501 : vector<2x32xf32>
    %503 = arith.addf %498, %502 : vector<2x32xf32>
    %504 = math.tanh %503 : vector<2x32xf32>
    %cst_90 = arith.constant 1.000000e+00 : f32
    %505 = vector.broadcast %cst_90 : f32 to vector<2x32xf32>
    %506 = arith.subf %505, %497 : vector<2x32xf32>
    %507 = arith.mulf %506, %504 : vector<2x32xf32>
    %508 = arith.mulf %497, %447 : vector<2x32xf32>
    %509 = arith.addf %507, %508 : vector<2x32xf32>
    %c0_91 = arith.constant 0 : index
    %c0_92 = arith.constant 0 : index
    %510 = vector.load %arg9[%c0_91, %c0_92] : memref<32x2xf32, #tpu.memory_space<vmem>>, vector<32x2xf32>
    %cst_93 = arith.constant dense<0.000000e+00> : vector<2x2xf32>
    %511 = tpu.matmul %509, %510, %cst_93 {dimension_numbers = #tpu.dot_dimension_numbers<[1], [0], [0], [1], [0, 0, 1, 1], [], []>} : vector<2x32xf32>, vector<32x2xf32>, vector<2x2xf32> -> vector<2x2xf32>
    %c0_94 = arith.constant 0 : index
    %c0_95 = arith.constant 0 : index
    %512 = vector.load %arg10[%c0_94, %c0_95] : memref<1x2xf32, #tpu.memory_space<vmem>>, vector<1x2xf32>
    %513 = vector.broadcast %512 : vector<1x2xf32> to vector<2x2xf32>
    %514 = arith.addf %511, %513 : vector<2x2xf32>
    %c0_96 = arith.constant 0 : index
    %c0_97 = arith.constant 0 : index
    %515 = vector.load %arg11[%c0_96, %c0_97] : memref<2x2xf32, #tpu.memory_space<vmem>>, vector<2x2xf32>
    tpu.vector_store %arg11[%c0_96, %c0_97], %514 {strides = array<i32>} : memref<2x2xf32, #tpu.memory_space<vmem>>, vector<2x2xf32>,
    return
  }
}

</mosaic_0001>

<bundles_post_ra>
// kernel: rnn_gru_forward.1
= control target key start
LH: loop header
LB: loop body
LE: loop exit
PB: predicated region body
PF: predicated region fallthrough
CT: control target
= control target key end

     0   :  { %s4217_s0 = inlined_call_operand.vmem [shape: f32[16,512], index: 0, kind: input, shape index: {}]   ;;  %s4218_s1 = inlined_call_operand.vmem [shape: f32[512,96], index: 1, kind: input, shape index: {}]   ;;  %s4219_s2 = inlined_call_operand.vmem [shape: f32[32,96], index: 2, kind: input, shape index: {}]   ;;  %s4220_s3 = inlined_call_operand.vmem [shape: f32[1,96], index: 3, kind: input, shape index: {}]   ;;  %s4221_s4 = inlined_call_operand.vmem [shape: f32[1,32], index: 4, kind: input, shape index: {}]   ;;  %s4222_s5 = inlined_call_operand.vmem [shape: f32[32,96], index: 5, kind: input, shape index: {}]   ;;  %s4223_s6 = inlined_call_operand.vmem [shape: f32[32,96], index: 6, kind: input, shape index: {}]   ;;  %s4224_s7 = inlined_call_operand.vmem [shape: f32[1,96], index: 7, kind: input, shape index: {}]   ;;  %s4225_s8 = inlined_call_operand.vmem [shape: f32[1,32], index: 8, kind: input, shape index: {}]   ;;  %s4226_s9 = inlined_call_operand.vmem [shape: f32[32,2], index: 9, kind: input, shape index: {}]   ;;  %s4227_s10 = inlined_call_operand.vmem [shape: f32[1,2], index: 10, kind: input, shape index: {}]   ;;  %s4228_s11 = inlined_call_operand.hbm [shape: f32[2,2], index: 11, kind: output, shape index: {}]  }
   0x1   :  { %v63_v0 = vld [vmem:[%s4218_s1 + $0x80] sm:$0xff]  ;;  %v64_v1 = vld [vmem:[%s4218_s1 + $0x88] sm:$0xff]  ;;  %v65_v11 = vld [vmem:[%s4218_s1 + $0x90] sm:$0xff] }
   0x2   :  { %v47_v2 = vld [vmem:[%s4218_s1] sm:$0xff]  ;;  %v3161_v3 = vpack.c.bf16 %v64_v1, %v63_v0  ;;  %v48_v4 = vld [vmem:[%s4218_s1 + $0x8] sm:$0xff]  ;;  %v66_v13 = vld [vmem:[%s4218_s1 + $0x98] sm:$0xff] }
   0x3   :  { %v95_v5 = vld [vmem:[%s4218_s1 + $0x180] sm:$0xff]  ;;  %v96_v6 = vld [vmem:[%s4218_s1 + $0x188] sm:$0xff]  ;;  %v3163_v7 = vpack.c.bf16 %v48_v4, %v47_v2  ;;  %v49_v14 = vld [vmem:[%s4218_s1 + $0x10] sm:$0xff]  ;;  %v3165_v16 = vpack.c.bf16 %v66_v13, %v65_v11 }
   0x4   :  { %v3193_v8 = vpack.c.bf16 %v96_v6, %v95_v5  ;;  %v79_v9 = vld [vmem:[%s4218_s1 + $0x100] sm:$0xff]  ;;  %v80_v10 = vld [vmem:[%s4218_s1 + $0x108] sm:$0xff]  ;;  %3162 = vmatprep.subr.bf16.mxu0 %v3161_v3  ;;  %v50_v15 = vld [vmem:[%s4218_s1 + $0x18] sm:$0xff] }
   0x5   :  { %v3195_v12 = vpack.c.bf16 %v80_v10, %v79_v9  ;;  %3164 = vmatpush3.bf16.msra.mxu0 %v3163_v7  ;;  %v3167_v17 = vpack.c.bf16 %v50_v15, %v49_v14  ;;  %v97_v18 = vld [vmem:[%s4218_s1 + $0x190] sm:$0xff]  ;;  %v98_v19 = vld [vmem:[%s4218_s1 + $0x198] sm:$0xff]  ;;  %v67_v23 = vld [vmem:[%s4218_s1 + $0xa0] sm:$0xff] }
   0x6   :  { %3194 = vmatprep.subr.bf16.mxu1 %v3193_v8  ;;  %v81_v20 = vld [vmem:[%s4218_s1 + $0x110] sm:$0xff]  ;;  %v3197_v21 = vpack.c.bf16 %v98_v19, %v97_v18  ;;  %v82_v22 = vld [vmem:[%s4218_s1 + $0x118] sm:$0xff]  ;;  %v68_v24 = vld [vmem:[%s4218_s1 + $0xa8] sm:$0xff]  ;;  %3166 = vmatprep.subr.bf16.mxu0 %v3165_v16 }
   0x7   :  { %3196 = vmatpush3.bf16.msra.mxu1 %v3195_v12  ;;  %v3199_v25 = vpack.c.bf16 %v82_v22, %v81_v20  ;;  %v3169_v26 = vpack.c.bf16 %v68_v24, %v67_v23  ;;  %v51_v27 = vld [vmem:[%s4218_s1 + $0x20] sm:$0xff]  ;;  %v52_v28 = vld [vmem:[%s4218_s1 + $0x28] sm:$0xff]  ;;  %v69_v35 = vld [vmem:[%s4218_s1 + $0xb0] sm:$0xff] }
   0x8   :  { %v99_v29 = vld [vmem:[%s4218_s1 + $0x1a0] sm:$0xff]  ;;  %3198 = vmatprep.subr.bf16.mxu1 %v3197_v21  ;;  %v100_v30 = vld [vmem:[%s4218_s1 + $0x1a8] sm:$0xff]  ;;  %v3171_v33 = vpack.c.bf16 %v52_v28, %v51_v27  ;;  %v70_v36 = vld [vmem:[%s4218_s1 + $0xb8] sm:$0xff] }
   0x9   :  { %v83_v31 = vld [vmem:[%s4218_s1 + $0x120] sm:$0xff]  ;;  %v84_v32 = vld [vmem:[%s4218_s1 + $0x128] sm:$0xff]  ;;  %3168 = vmatpush3.bf16.msra.mxu0 %v3167_v17  ;;  %v3201_v34 = vpack.c.bf16 %v100_v30, %v99_v29  ;;  %v53_v37 = vld [vmem:[%s4218_s1 + $0x30] sm:$0xff]  ;;  %v3173_v39 = vpack.c.bf16 %v70_v36, %v69_v35 }
   0xa   :  { %3170 = vmatprep.subr.bf16.mxu0 %v3169_v26  ;;  %v3203_v38 = vpack.c.bf16 %v84_v32, %v83_v31  ;;  %v54_v40 = vld [vmem:[%s4218_s1 + $0x38] sm:$0xff]  ;;  %v101_v41 = vld [vmem:[%s4218_s1 + $0x1b0] sm:$0xff]  ;;  %v71_v46 = vld [vmem:[%s4218_s1 + $0xc0] sm:$0xff] }
   0xb   :  { %3200 = vmatpush3.bf16.msra.mxu1 %v3199_v25  ;;  %v102_v42 = vld [vmem:[%s4218_s1 + $0x1b8] sm:$0xff]  ;;  %v85_v44 = vld [vmem:[%s4218_s1 + $0x130] sm:$0xff]  ;;  %v72_v47 = vld [vmem:[%s4218_s1 + $0xc8] sm:$0xff]  ;;  %v3175_v48 = vpack.c.bf16 %v54_v40, %v53_v37 }
   0xc   :  { %3202 = vmatprep.subr.bf16.mxu1 %v3201_v34  ;;  %v3205_v43 = vpack.c.bf16 %v102_v42, %v101_v41  ;;  %v86_v45 = vld [vmem:[%s4218_s1 + $0x138] sm:$0xff]  ;;  %v103_v49 = vld [vmem:[%s4218_s1 + $0x1c0] sm:$0xff]  ;;  %v104_v50 = vld [vmem:[%s4218_s1 + $0x1c8] sm:$0xff]  ;;  %v3177_v52 = vpack.c.bf16 %v72_v47, %v71_v46 }
   0xd   :  { %3172 = vmatpush3.bf16.msra.mxu0 %v3171_v33  ;;  %v3207_v51 = vpack.c.bf16 %v86_v45, %v85_v44  ;;  %v55_v53 = vld [vmem:[%s4218_s1 + $0x40] sm:$0xff]  ;;  %v56_v54 = vld [vmem:[%s4218_s1 + $0x48] sm:$0xff]  ;;  %v3209_v56 = vpack.c.bf16 %v104_v50, %v103_v49  ;;  %v73_v58 = vld [vmem:[%s4218_s1 + $0xd0] sm:$0xff] }
   0xe   :  { %3174 = vmatprep.subr.bf16.mxu0 %v3173_v39  ;;  %v87_v55 = vld [vmem:[%s4218_s1 + $0x140] sm:$0xff]  ;;  %v88_v57 = vld [vmem:[%s4218_s1 + $0x148] sm:$0xff]  ;;  %v74_v59 = vld [vmem:[%s4218_s1 + $0xd8] sm:$0xff]  ;;  %v3179_v62 = vpack.c.bf16 %v56_v54, %v55_v53 }
   0xf   :  { %3204 = vmatpush3.bf16.msra.mxu1 %v3203_v38  ;;  %v105_v60 = vld [vmem:[%s4218_s1 + $0x1d0] sm:$0xff]  ;;  %v106_v61 = vld [vmem:[%s4218_s1 + $0x1d8] sm:$0xff]  ;;  %v3211_v63 = vpack.c.bf16 %v88_v57, %v87_v55  ;;  %v3181_v0 = vpack.c.bf16 %v74_v59, %v73_v58  ;;  %v75_v6 = vld [vmem:[%s4218_s1 + $0xe0] sm:$0xff] }
  0x10   :  { %3206 = vmatprep.subr.bf16.mxu1 %v3205_v43  ;;  %v57_v1 = vld [vmem:[%s4218_s1 + $0x50] sm:$0xff]  ;;  %v58_v2 = vld [vmem:[%s4218_s1 + $0x58] sm:$0xff]  ;;  %v3213_v4 = vpack.c.bf16 %v106_v61, %v105_v60  ;;  %v76_v7 = vld [vmem:[%s4218_s1 + $0xe8] sm:$0xff] }
  0x11   :  { %3176 = vmatpush3.bf16.msra.mxu0 %v3175_v48  ;;  %v89_v3 = vld [vmem:[%s4218_s1 + $0x150] sm:$0xff]  ;;  %v90_v5 = vld [vmem:[%s4218_s1 + $0x158] sm:$0xff]  ;;  %v107_v8 = vld [vmem:[%s4218_s1 + $0x1e0] sm:$0xff]  ;;  %v3183_v10 = vpack.c.bf16 %v58_v2, %v57_v1  ;;  %v3185_v14 = vpack.c.bf16 %v76_v7, %v75_v6 }
  0x12   :  { %3178 = vmatprep.subr.bf16.mxu0 %v3177_v52  ;;  %v108_v9 = vld [vmem:[%s4218_s1 + $0x1e8] sm:$0xff]  ;;  %v59_v11 = vld [vmem:[%s4218_s1 + $0x60] sm:$0xff]  ;;  %v3215_v13 = vpack.c.bf16 %v90_v5, %v89_v3  ;;  %v77_v19 = vld [vmem:[%s4218_s1 + $0xf0] sm:$0xff] }
  0x13   :  { %3208 = vmatpush3.bf16.msra.mxu1 %v3207_v51  ;;  %v40_v12 = vld [vmem:[%s4217_s0 + $0x8] sm:$0xff]  ;;  %v91_v16 = vld [vmem:[%s4218_s1 + $0x160] sm:$0xff]  ;;  %v3217_v18 = vpack.c.bf16 %v108_v9, %v107_v8  ;;  %v78_v20 = vld [vmem:[%s4218_s1 + $0xf8] sm:$0xff] }
  0x14   :  { %3210 = vmatprep.subr.bf16.mxu1 %v3209_v56  ;;  %v60_v15 = vld [vmem:[%s4218_s1 + $0x68] sm:$0xff]  ;;  %182 = vmatprep.mubr.f32.mxu0 %v40_v12  ;;  %v42_v21 = vld [vmem:[%s4217_s0 + $0x18] sm:$0xff]  ;;  %v109_v22 = vld [vmem:[%s4218_s1 + $0x1f0] sm:$0xff]  ;;  %v3189_v27 = vpack.c.bf16 %v78_v20, %v77_v19 }
  0x15   :  { %3180 = vmatpush3.bf16.msra.mxu0 %v3179_v62  ;;  %v92_v17 = vld [vmem:[%s4218_s1 + $0x168] sm:$0xff]  ;;  %v110_v23 = vld [vmem:[%s4218_s1 + $0x1f8] sm:$0xff]  ;;  %257 = vmatprep.mubr.f32.mxu1 %v42_v21  ;;  %v3187_v24 = vpack.c.bf16 %v60_v15, %v59_v11  ;;  %v61_v25 = vld [vmem:[%s4218_s1 + $0x70] sm:$0xff] }
  0x16   :  { %3182 = vmatprep.subr.bf16.mxu0 %v3181_v0  ;;  %v3219_v26 = vpack.c.bf16 %v92_v17, %v91_v16  ;;  %v62_v28 = vld [vmem:[%s4218_s1 + $0x78] sm:$0xff]  ;;  %v2643_v29 = vld [vmem:[%s4221_s4] ss:$0 sm:$0xff] }
  0x17   :  { %3212 = vmatpush3.bf16.msra.mxu1 %v3211_v63 }
  0x18   :  { %3214 = vmatprep.subr.bf16.mxu1 %v3213_v4 }
  0x19   :  { %3184 = vmatpush3.bf16.msra.mxu0 %v3183_v10 }
  0x1a   :  { %3186 = vmatprep.subr.bf16.mxu0 %v3185_v14 }
  0x1b   :  { %3216 = vmatpush3.bf16.msra.mxu1 %v3215_v13 }
  0x1c   :  { %16 = vsyncpa [#allocation3], 0  ;;  %3218 = vmatprep.subr.bf16.mxu1 %v3217_v18  ;;  %v3221_v30 = vpack.c.bf16 %v110_v23, %v109_v22  ;;  %v93_v31 = vld [vmem:[%s4218_s1 + $0x170] sm:$0xff]  ;;  %v94_v32 = vld [vmem:[%s4218_s1 + $0x178] sm:$0xff]  ;;  %s3502_s18 = smov 64   ;;  %v3191_v33 = vpack.c.bf16 %v62_v28, %v61_v25  ;;  %v3503_v39 = vmov 0.0|0.0  }
  0x1d   :  { %369 = vrot.lane.b32.xlu0 %v2643_v29, %s3502_s18  ;;  %3188 = vmatpush3.bf16.msra.mxu0 %v3187_v24  ;;  %v3223_v34 = vpack.c.bf16 %v94_v32, %v93_v31  ;;  %v272_v35 = vld [vmem:[%s4219_s2] sm:$0xff]  ;;  %v273_v36 = vld [vmem:[%s4219_s2 + $0x8] sm:$0xff]  ;;  %v41_v40 = vld [vmem:[%s4217_s0 + $0x10] sm:$0xff]  ;;  %vm3504_vm0 = vmmov 0   ;;  %v3505_v48 = vmov 0.0   ;;  %vm283_vm1 = vcmask 261120  }
  0x1e   :  { %3190 = vmatprep.subr.bf16.mxu0 %v3189_v27  ;;  %v39_v37 = vld [vmem:[%s4217_s0] sm:$0xff]  ;;  %v3779_v38 = vpack.c.bf16 %v273_v36, %v272_v35  ;;  %v274_v41 = vld [vmem:[%s4219_s2 + $0x10] sm:$0xff]  ;;  %v275_v42 = vld [vmem:[%s4219_s2 + $0x18] sm:$0xff]  ;;  %s3507_s21 = smov [#allocation2]   ;;  %vm2625_vm2 = vcmask 9216  }
  0x1f   :  { %3220 = vmatpush3.bf16.msra.mxu1 %v3219_v26  ;;  %v44_v43 = vld [vmem:[%s4217_s0 + $0x28] sm:$0xff]  ;;  %v46_v44 = vld [vmem:[%s4217_s0 + $0x38] sm:$0xff]  ;;  %v43_v45 = vld [vmem:[%s4217_s0 + $0x20] sm:$0xff]  ;;  %v3802_v46 = vpack.c.bf16 %v275_v42, %v274_v41  ;;  %s2633_s22 = sshll.u32 %s3507_s21, 4  ;;  %s2634_s22 = int_to_ptr.vmem [resolvable:$true] %s2633_s22 }
  0x20   :  { %3222 = vmatprep.subr.bf16.mxu1 %v3221_v30  ;;  %v45_v47 = vld [vmem:[%s4217_s0 + $0x30] sm:$0xff]  ;;  %v2641_v50 = vld [vmem:[%s4220_s3] ss:$0 sm:$0xff]  ;;  %v277_v16 = vld [vmem:[%s4223_s6 + $0x8] sm:$0xff]  ;;  %s3478_s1 = scalar_lea.vmem %s2634_s22, 32  ;;  %p3483_p1 = scmp.lt.s32.totalorder %s2634_s22, %s2634_s22 }
  0x21   :  { %3192 = vmatpush3.bf16.msra.mxu0 %v3191_v33  ;;  %v276_v15 = vld [vmem:[%s4223_s6] sm:$0xff]  ;;  %v278_v17 = vld [vmem:[%s4223_s6 + $0x10] sm:$0xff]  ;;  %v279_v19 = vld [vmem:[%s4223_s6 + $0x18] sm:$0xff]  ;;  %p3479_p0 = scmp.ne.s32.totalorder %s2634_s22, %s3478_s1  ;;  %p3484_p2 = scmp.lt.s32.totalorder %s3478_s1, %s3478_s1 }
  0x22   :  { %3225 = vmatprep.subr.bf16.mxu0 %v3503_v39  ;;  %v3840_v18 = vpack.c.bf16 %v277_v16, %v276_v15  ;;  %v268_v20 = vld [vmem:[%s4222_s5] sm:$0xff]  ;;  %v269_v21 = vld [vmem:[%s4222_s5 + $0x8] sm:$0xff]  ;;  %v270_v23 = vld [vmem:[%s4222_s5 + $0x10] sm:$0xff]  ;;  %v3860_v25 = vpack.c.bf16 %v279_v19, %v278_v17 }
  0x23   :  { %3224 = vmatpush3.bf16.msra.mxu1 %v3223_v34  ;;  %v3851_v22 = vpack.c.bf16 %v269_v21, %v268_v20  ;;  %v271_v24 = vld [vmem:[%s4222_s5 + $0x18] sm:$0xff]  ;;  %s3506_s5 = smov 96   ;;  %v2647_v30 = vld [vmem:[%s4225_s8] ss:$0 sm:$0xff]  ;;  %p3485_p3 = por %p3484_p2, %p3483_p1 }
  0x24   :  { %3231 = vmatprep.subr.bf16.mxu1 %v3503_v39  ;;  %183 = vmatmul.mubr.f32.vlgmr.msra.gmra.mrb[0].mxu0 %v39_v37  ;;  %v3864_v26 = vpack.c.bf16 %v271_v24, %v270_v23  ;;  %v3908_v41 = vld [vmem:[%s4224_s7] ss:$0 sm:$0xff] }
  0x25   :  { %3227 = vmatpush3.bf16.msra.mxu0 %v3779_v38  ;;  %187 = vmatprep.mubr.f32.mxu0 %v44_v43  ;;  %p3486_p4 = pnand %p3485_p3, %p3479_p0 }
  0x26   :  { %258 = vmatmul.mubr.f32.vlgmr.msra.gmra.mrb[0].mxu1 %v41_v40  ;;  %3228 = vmatprep.subr.bf16.mxu0 %v3503_v39 }
  0x27   :  { %262 = vmatprep.mubr.f32.mxu1 %v46_v44  ;;  %3233 = vmatpush3.bf16.msra.mxu1 %v3851_v22 }
  0x28   :  { %188 = vmatmul.mubr.f32.gmra.mrb[2].mxu0 %v43_v45  ;;  %3234 = vmatprep.subr.bf16.mxu1 %v3503_v39 }
  0x29   :  { %3230 = vmatpush3.bf16.msra.mxu0 %v3802_v46  ;;  %2894 = vmatprep.mubr.msk.f32.mxu0 %vm3504_vm0, %v3505_v48 }
  0x2a   :  { %263 = vmatmul.mubr.f32.gmra.mrb[2].mxu1 %v45_v47  ;;  %3237 = vmatprep.subr.bf16.mxu0 %v3503_v39 }
  0x2b   :  { %2905 = vmatprep.mubr.msk.f32.mxu1 %vm3504_vm0, %v3505_v48  ;;  %3236 = vmatpush3.bf16.msra.mxu1 %v3864_v26 }
  0x2c   :  { %2895 = vmatmul.mubr.f32.vlgmr.msra.gmra.mrb[4].mxu0 %v3505_v48  ;;  %3243 = vmatprep.subr.bf16.mxu1 %v3503_v39 }
  0x2d   :  { %2916 = vmatprep.mubr.msk.f32.mxu0 %vm3504_vm0, %v3505_v48  ;;  %3239 = vmatpush3.bf16.msra.mxu0 %v3840_v18 }
  0x2e   :  { %3240 = vmatprep.subr.bf16.mxu0 %v3503_v39 }
  0x31   :  { %3242 = vmatpush3.bf16.msra.mxu0 %v3860_v25 }
  0x32   :  { %3249 = vmatprep.subr.bf16.mxu0 %v3503_v39 }
  0x34   :  { %2917 = vmatmul.mubr.f32.vlgmr.msra.gmra.mrb[6].mxu0 %v3505_v48 }
  0x35   :  { %3251 = vmatpush3.bf16.msra.mxu0 %v3851_v22  ;;  %2938 = vmatprep.mubr.msk.f32.mxu0 %vm3504_vm0, %v3505_v48 }
  0x36   :  { %3252 = vmatprep.subr.bf16.mxu0 %v3503_v39 }
  0x39   :  { %3254 = vmatpush3.bf16.msra.mxu0 %v3864_v26 }
  0x3a   :  { %3261 = vmatprep.subr.bf16.mxu0 %v3503_v39 }
  0x8f   :  { %v3822_v63 = vpop.permute.xlu0 %369 }
  0xf7   :  { %v2717_v49 = vpop.f32.mrb[0].mxu0 }
  0xf8   :  { %v2718_v51 = vpop.f32.mrb[1].mxu0 }
  0xf9   :  { %v2755_v52 = vpop.f32.mrb[0].mxu1  ;;  %v2719_v53 = vadd.f32 %v2718_v51, %v2717_v49 }
  0xfa   :  { %v2756_v54 = vpop.f32.mrb[1].mxu1 }
  0xfb   :  { %v2757_v55 = vadd.f32 %v2756_v54, %v2755_v52  ;;  %v185_v56 = vadd.f32 %v2719_v53, %v2641_v50  ;;  %v2720_v57 = vpop.f32.mrb[2].mxu0 }
  0xfc   :  { %v2721_v58 = vpop.f32.mrb[3].mxu0 }
  0xfd   :  { %v2758_v59 = vpop.f32.mrb[2].mxu1  ;;  %v3820_v60 = vadd.f32 %v2757_v55, %v185_v56  ;;  %v2722_v61 = vadd.f32 %v2721_v58, %v2720_v57 }
  0xfe   :  { %v2759_v62 = vpop.f32.mrb[3].mxu1 }
  0xff   :  { %v2760_v0 = vadd.f32 %v2759_v62, %v2758_v59  ;;  %v190_v1 = vadd.f32 %v2722_v61, %v2641_v50  ;;  %v353_v2 = vpop.f32.mrb[4].mxu0 }
 0x100   :  { %v372_v3 = vadd.f32 %v3822_v63, %v353_v2  ;;  %v2896_v4 = vpop.f32.mrb[5].mxu0  ;;  %v357_v6 = vadd.f32 %v353_v2, %v3820_v60 }
 0x101   :  { %v3825_v5 = vadd.f32 %v2760_v0, %v190_v1 }
 0x102   :  { %374 = vrot.lane.b32.xlu0 %v372_v3, %s3502_s18  ;;  %v2642_v7 = vmul.f32 -1.442695, %v357_v6 }
 0x104   :  { %3381 = vpow2.f32 %v2642_v7 }
 0x107   :  { %v539_v34 = vpop.f32.mrb[6].mxu0 }
 0x108   :  { %v2918_v35 = vpop.f32.mrb[7].mxu0 }
 0x10e   :  { %v3382_v8 = vpop.eup %3381 }
 0x10f   :  { %v361_v9 = vadd.f32 1.0, %v3382_v8 }
 0x111   :  { %3383 = vrcp.f32 %v361_v9 }
 0x11b   :  { %v3384_v10 = vpop.eup %3383 }
 0x11c   :  { %v384_v28 = vsub.f32 1.0, %v3384_v10  ;;  %v390_v31 = vmul.f32 0.0, %v3384_v10 }
 0x174   :  { %v375_v11 = vpop.permute.xlu0 %374 }
 0x175   :  { %v377_v12 = vmul.f32 %v3384_v10, %v375_v11 }
 0x177   :  { %379 = vrot.lane.b32.xlu1 %v377_v12, %s3502_s18 }
 0x1e9   :  { %v380_v13 = vpop.permute.xlu1 %379 }
 0x1ea   :  { %v382_v14 = vadd.f32 %v380_v13, %v3820_v60 }
 0x1ec   :  { %3385 = vtanh.f32 %v382_v14 }
 0x1f6   :  { %v3386_v27 = vpop.eup %3385 }
 0x1f7   :  { %386 = vrot.lane.b32.xlu1 %v3386_v27, %s3506_s5 }
 0x1fb   :  { %555 = vrot.lane.b32.xlu1 %v2647_v30, %s3502_s18 }
 0x269   :  { %v387_v29 = vpop.permute.xlu1 %386 }
 0x26a   :  { %v389_v32 = vmul.f32 %v387_v29, %v384_v28 }
 0x26c   :  { %v3883_v33 = vadd.f32 %v390_v31, %v389_v32 }
 0x26d   :  { %v3887_v36 = vpop.permute.xlu1 %555 }
 0x26e   :  { %399 = vrot.lane.b32.xlu0 %v3883_v33, %s3506_s5  ;;  %v558_v37 = vadd.f32 %v3887_v36, %v539_v34  ;;  %v677_v16 = vrot.slane %v3883_v33, 6 }
 0x270   :  { %560 = vrot.lane.b32.xlu1 %v558_v37, %s3502_s18 }
 0x2e0   :  { %v400_v40 = vpop.permute.xlu0 %399 }
 0x2e1   :  { %2906 = vmatmul.mubr.msk.f32.vlgmr.msra.gmra.mrb[4].mxu1 %vm283_vm1, %v400_v40 }
 0x2e2   :  { %3245 = vmatpush3.bf16.msra.mxu1 %v3779_v38  ;;  %2927 = vmatprep.mubr.msk.f32.mxu1 %vm3504_vm0, %v3505_v48  ;;  %v561_v55 = vpop.permute.xlu1 %560 }
 0x2e3   :  { %3246 = vmatprep.subr.bf16.mxu1 %v3503_v39 }
 0x2e6   :  { %3248 = vmatpush3.bf16.msra.mxu1 %v3802_v46 }
 0x2e7   :  { %3255 = vmatprep.subr.bf16.mxu1 %v3503_v39 }
 0x2e9   :  { %2928 = vmatmul.mubr.msk.f32.vlgmr.msra.gmra.mrb[6].mxu1 %vm283_vm1, %v400_v40 }
 0x2ea   :  { %3257 = vmatpush3.bf16.msra.mxu1 %v3840_v18  ;;  %2949 = vmatprep.mubr.msk.f32.mxu1 %vm3504_vm0, %v3505_v48 }
 0x2eb   :  { %3258 = vmatprep.subr.bf16.mxu1 %v3503_v39 }
 0x2ee   :  { %3260 = vmatpush3.bf16.msra.mxu1 %v3860_v25 }
 0x2ef   :  { %3267 = vmatprep.subr.bf16.mxu1 %v3503_v39 }
 0x3b4   :  { %v469_v42 = vpop.f32.mrb[4].mxu1 }
 0x3b5   :  { %v470_v43 = vadd.f32 %v3908_v41, %v469_v42  ;;  %v2907_v44 = vpop.f32.mrb[5].mxu1 }
 0x3b7   :  { %v543_v45 = vadd.f32 %v539_v34, %v470_v43 }
 0x3b9   :  { %v2646_v47 = vmul.f32 -1.442695, %v543_v45 }
 0x3bb   :  { %3387 = vpow2.f32 %v2646_v47 }
 0x3bc   :  { %v644_v49 = vpop.f32.mrb[6].mxu1 }
 0x3bd   :  { %v658_v50 = vadd.f32 %v644_v49, %v3822_v63  ;;  %v2929_v51 = vpop.f32.mrb[7].mxu1  ;;  %v649_v58 = vrot.slane %v644_v49, 6 }
 0x3bf   :  { %v660_v52 = vrot.slane %v658_v50, 6  ;;  %v651_v59 = vadd.f32 %v649_v58, %v3820_v60 }
 0x3c1   :  { %661 = vrot.lane.b32.xlu0 %v660_v52, %s3502_s18  ;;  %v2649_v61 = vmul.f32 -1.442695, %v651_v59 }
 0x3c5   :  { %v3388_v53 = vpop.eup %3387 }
 0x3c6   :  { %v547_v54 = vadd.f32 1.0, %v3388_v53 }
 0x3c8   :  { %3389 = vrcp.f32 %v547_v54 }
 0x3c9   :  { %3391 = vpow2.f32 %v2649_v61 }
 0x3d2   :  { %v3390_v56 = vpop.eup %3389 }
 0x3d3   :  { %v563_v57 = vmul.f32 %v3390_v56, %v561_v55  ;;  %v3392_v62 = vpop.eup %3391  ;;  %v570_v11 = vsub.f32 1.0, %v3390_v56  ;;  %v576_v13 = vmul.f32 0.0, %v3390_v56 }
 0x3d4   :  { %v655_v0 = vadd.f32 1.0, %v3392_v62 }
 0x3d5   :  { %565 = vrot.lane.b32.xlu1 %v563_v57, %s3502_s18 }
 0x3d6   :  { %3393 = vrcp.f32 %v655_v0 }
 0x3e0   :  { %v3394_v1 = vpop.eup %3393 }
 0x3e1   :  { %v671_v17 = vsub.f32 1.0, %v3394_v1  ;;  %v679_v21 = vmul.f32 %v3394_v1, %v677_v16 }
 0x433   :  { %v662_v2 = vpop.permute.xlu0 %661 }
 0x434   :  { %v664_v3 = vmul.f32 %v3394_v1, %v662_v2 }
 0x436   :  { %666 = vrot.lane.b32.xlu0 %v664_v3, %s3502_s18 }
 0x447   :  { %v566_v4 = vpop.permute.xlu1 %565 }
 0x448   :  { %v568_v6 = vadd.f32 %v566_v4, %v470_v43 }
 0x44a   :  { %3395 = vtanh.f32 %v568_v6 }
 0x454   :  { %v3396_v7 = vpop.eup %3395 }
 0x455   :  { %572 = vrot.lane.b32.xlu1 %v3396_v7, %s3506_s5 }
 0x4a8   :  { %v667_v8 = vpop.permute.xlu0 %666 }
 0x4a9   :  { %v669_v9 = vadd.f32 %v667_v8, %v3820_v60 }
 0x4ab   :  { %3397 = vtanh.f32 %v669_v9 }
 0x4b5   :  { %v3398_v10 = vpop.eup %3397 }
 0x4b6   :  { %673 = vrot.lane.b32.xlu0 %v3398_v10, %s3506_s5 }
 0x4c7   :  { %v573_v12 = vpop.permute.xlu1 %572 }
 0x4c8   :  { %v575_v14 = vmul.f32 %v573_v12, %v570_v11 }
 0x4ca   :  { %v3919_v15 = vadd.f32 %v576_v13, %v575_v14 }
 0x4cc   :  { %758 = vrot.lane.b32.xlu1 %v3919_v15, %s3506_s5 }
 0x528   :  { %v674_v19 = vpop.permute.xlu0 %673 }
 0x529   :  { %v676_v20 = vmul.f32 %v674_v19, %v671_v17 }
 0x52b   :  { %v3924_v23 = vadd.f32 %v679_v21, %v676_v20 }
 0x52d   :  { %v682_v24 = vrot.slane %v3924_v23, 2  ;;  %v958_v10 = vrot.slane %v3924_v23, 6 }
 0x52f   :  { %683 = vrot.lane.b32.xlu0 %v682_v24, %s3506_s5 }
 0x53e   :  { %v759_v27 = vpop.permute.xlu1 %758 }
 0x53f   :  { %2950 = vmatmul.mubr.msk.f32.vlgmr.msra.gmra.mrb[8].mxu1 %vm283_vm1, %v759_v27 }
 0x540   :  { %3269 = vmatpush3.bf16.msra.mxu1 %v3851_v22  ;;  %2971 = vmatprep.mubr.msk.f32.mxu1 %vm3504_vm0, %v3505_v48 }
 0x541   :  { %3270 = vmatprep.subr.bf16.mxu1 %v3503_v39 }
 0x544   :  { %3272 = vmatpush3.bf16.msra.mxu1 %v3864_v26 }
 0x545   :  { %3279 = vmatprep.subr.bf16.mxu1 %v3503_v39 }
 0x5a1   :  { %v684_v28 = vpop.permute.xlu0 %683 }
 0x5a2   :  { %2939 = vmatmul.mubr.msk.f32.vlgmr.msra.gmra.mrb[8].mxu0 %vm283_vm1, %v684_v28 }
 0x5a3   :  { %3263 = vmatpush3.bf16.msra.mxu0 %v3779_v38  ;;  %2960 = vmatprep.mubr.msk.f32.mxu0 %vm3504_vm0, %v3505_v48 }
 0x5a4   :  { %3264 = vmatprep.subr.bf16.mxu0 %v3503_v39 }
 0x5a7   :  { %3266 = vmatpush3.bf16.msra.mxu0 %v3802_v46 }
 0x5a8   :  { %3273 = vmatprep.subr.bf16.mxu0 %v3503_v39 }
 0x5aa   :  { %2961 = vmatmul.mubr.msk.f32.vlgmr.msra.gmra.mrb[10].mxu0 %vm283_vm1, %v684_v28 }
 0x5ab   :  { %3275 = vmatpush3.bf16.msra.mxu0 %v3840_v18  ;;  %2982 = vmatprep.mubr.msk.f32.mxu0 %vm3504_vm0, %v3505_v48 }
 0x5ac   :  { %3276 = vmatprep.subr.bf16.mxu0 %v3503_v39 }
 0x5af   :  { %3278 = vmatpush3.bf16.msra.mxu0 %v3860_v25 }
 0x5b0   :  { %3285 = vmatprep.subr.bf16.mxu0 %v3503_v39 }
 0x612   :  { %v828_v29 = vpop.f32.mrb[8].mxu1 }
 0x613   :  { %v839_v30 = vadd.f32 %v828_v29, %v3887_v36  ;;  %v2951_v31 = vpop.f32.mrb[9].mxu1 }
 0x615   :  { %841 = vrot.lane.b32.xlu1 %v839_v30, %s3502_s18 }
 0x675   :  { %v753_v32 = vpop.f32.mrb[8].mxu0 }
 0x676   :  { %v754_v33 = vadd.f32 %v3908_v41, %v753_v32  ;;  %v2940_v34 = vpop.f32.mrb[9].mxu0 }
 0x678   :  { %v832_v35 = vadd.f32 %v828_v29, %v754_v33 }
 0x67a   :  { %v2652_v37 = vmul.f32 -1.442695, %v832_v35 }
 0x67c   :  { %3399 = vpow2.f32 %v2652_v37 }
 0x67d   :  { %v925_v40 = vpop.f32.mrb[10].mxu0 }
 0x67e   :  { %v939_v42 = vadd.f32 %v925_v40, %v3822_v63  ;;  %v2962_v43 = vpop.f32.mrb[11].mxu0  ;;  %v930_v52 = vrot.slane %v925_v40, 4 }
 0x680   :  { %v941_v44 = vrot.slane %v939_v42, 4  ;;  %v932_v53 = vadd.f32 %v930_v52, %v3820_v60 }
 0x682   :  { %942 = vrot.lane.b32.xlu0 %v941_v44, %s3502_s18  ;;  %v2654_v54 = vmul.f32 -1.442695, %v932_v53 }
 0x686   :  { %v3400_v45 = vpop.eup %3399 }
 0x687   :  { %v836_v47 = vadd.f32 1.0, %v3400_v45  ;;  %v842_v50 = vpop.permute.xlu1 %841 }
 0x689   :  { %3401 = vrcp.f32 %v836_v47 }
 0x68a   :  { %3403 = vpow2.f32 %v2654_v54 }
 0x693   :  { %v3402_v49 = vpop.eup %3401 }
 0x694   :  { %v844_v51 = vmul.f32 %v3402_v49, %v842_v50  ;;  %v3404_v55 = vpop.eup %3403  ;;  %v851_v4 = vsub.f32 1.0, %v3402_v49  ;;  %v857_v7 = vmul.f32 %v3402_v49, %v3919_v15 }
 0x695   :  { %v936_v56 = vadd.f32 1.0, %v3404_v55 }
 0x696   :  { %846 = vrot.lane.b32.xlu1 %v844_v51, %s3502_s18 }
 0x697   :  { %3405 = vrcp.f32 %v936_v56 }
 0x6a1   :  { %v3406_v57 = vpop.eup %3405 }
 0x6a2   :  { %v952_v11 = vsub.f32 1.0, %v3406_v57  ;;  %v960_v13 = vmul.f32 %v3406_v57, %v958_v10 }
 0x6f4   :  { %v943_v58 = vpop.permute.xlu0 %942 }
 0x6f5   :  { %v945_v59 = vmul.f32 %v3406_v57, %v943_v58 }
 0x6f7   :  { %947 = vrot.lane.b32.xlu0 %v945_v59, %s3502_s18 }
 0x708   :  { %v847_v61 = vpop.permute.xlu1 %846 }
 0x709   :  { %v849_v62 = vadd.f32 %v847_v61, %v754_v33 }
 0x70b   :  { %3407 = vtanh.f32 %v849_v62 }
 0x715   :  { %v3408_v0 = vpop.eup %3407 }
 0x716   :  { %853 = vrot.lane.b32.xlu1 %v3408_v0, %s3506_s5 }
 0x769   :  { %v948_v1 = vpop.permute.xlu0 %947 }
 0x76a   :  { %v950_v2 = vadd.f32 %v948_v1, %v3820_v60 }
 0x76c   :  { %3409 = vtanh.f32 %v950_v2 }
 0x776   :  { %v3410_v3 = vpop.eup %3409 }
 0x777   :  { %954 = vrot.lane.b32.xlu0 %v3410_v3, %s3506_s5 }
 0x788   :  { %v854_v6 = vpop.permute.xlu1 %853 }
 0x789   :  { %v856_v8 = vmul.f32 %v854_v6, %v851_v4 }
 0x78b   :  { %v3961_v9 = vadd.f32 %v857_v7, %v856_v8 }
 0x78d   :  { %1039 = vrot.lane.b32.xlu1 %v3961_v9, %s3506_s5 }
 0x7e9   :  { %v955_v12 = vpop.permute.xlu0 %954 }
 0x7ea   :  { %v957_v14 = vmul.f32 %v955_v12, %v952_v11 }
 0x7ec   :  { %v3966_v16 = vadd.f32 %v960_v13, %v957_v14 }
 0x7ee   :  { %v963_v17 = vrot.slane %v3966_v16, 4  ;;  %v1239_v3 = vrot.slane %v3966_v16, 6 }
 0x7f0   :  { %964 = vrot.lane.b32.xlu0 %v963_v17, %s3506_s5 }
 0x7ff   :  { %v1040_v19 = vpop.permute.xlu1 %1039 }
 0x800   :  { %2983 = vmatmul.mubr.msk.f32.vlgmr.msra.gmra.mrb[12].mxu0 %vm283_vm1, %v1040_v19 }
 0x801   :  { %3287 = vmatpush3.bf16.msra.mxu0 %v3851_v22  ;;  %3004 = vmatprep.mubr.msk.f32.mxu0 %vm3504_vm0, %v3505_v48 }
 0x802   :  { %3288 = vmatprep.subr.bf16.mxu0 %v3503_v39 }
 0x805   :  { %3290 = vmatpush3.bf16.msra.mxu0 %v3864_v26 }
 0x806   :  { %3297 = vmatprep.subr.bf16.mxu0 %v3503_v39 }
 0x862   :  { %v965_v15 = vpop.permute.xlu0 %964 }
 0x863   :  { %2972 = vmatmul.mubr.msk.f32.vlgmr.msra.gmra.mrb[10].mxu1 %vm283_vm1, %v965_v15 }
 0x864   :  { %3281 = vmatpush3.bf16.msra.mxu1 %v3779_v38  ;;  %2993 = vmatprep.mubr.msk.f32.mxu1 %vm3504_vm0, %v3505_v48 }
 0x865   :  { %3282 = vmatprep.subr.bf16.mxu1 %v3503_v39 }
 0x868   :  { %3284 = vmatpush3.bf16.msra.mxu1 %v3802_v46 }
 0x869   :  { %3291 = vmatprep.subr.bf16.mxu1 %v3503_v39 }
 0x86b   :  { %2994 = vmatmul.mubr.msk.f32.vlgmr.msra.gmra.mrb[12].mxu1 %vm283_vm1, %v965_v15 }
 0x86c   :  { %3293 = vmatpush3.bf16.msra.mxu1 %v3840_v18  ;;  %3015 = vmatprep.mubr.msk.f32.mxu1 %vm3504_vm0, %v3505_v48 }
 0x86d   :  { %3294 = vmatprep.subr.bf16.mxu1 %v3503_v39 }
 0x870   :  { %3296 = vmatpush3.bf16.msra.mxu1 %v3860_v25 }
 0x871   :  { %3303 = vmatprep.subr.bf16.mxu1 %v3503_v39 }
 0x8d3   :  { %v1109_v20 = vpop.f32.mrb[12].mxu0 }
 0x8d4   :  { %v1120_v21 = vadd.f32 %v1109_v20, %v3887_v36  ;;  %v2984_v23 = vpop.f32.mrb[13].mxu0 }
 0x8d6   :  { %1122 = vrot.lane.b32.xlu1 %v1120_v21, %s3502_s18 }
 0x936   :  { %v1034_v24 = vpop.f32.mrb[10].mxu1 }
 0x937   :  { %v1035_v27 = vadd.f32 %v3908_v41, %v1034_v24  ;;  %v2973_v28 = vpop.f32.mrb[11].mxu1 }
 0x939   :  { %v1113_v29 = vadd.f32 %v1109_v20, %v1035_v27 }
 0x93b   :  { %v2657_v30 = vmul.f32 -1.442695, %v1113_v29 }
 0x93d   :  { %3411 = vpow2.f32 %v2657_v30 }
 0x93e   :  { %v1206_v31 = vpop.f32.mrb[12].mxu1 }
 0x93f   :  { %v1220_v32 = vadd.f32 %v1206_v31, %v3822_v63  ;;  %v2995_v33 = vpop.f32.mrb[13].mxu1  ;;  %v1211_v44 = vrot.slane %v1206_v31, 2 }
 0x941   :  { %v1222_v34 = vrot.slane %v1220_v32, 2  ;;  %v1213_v45 = vadd.f32 %v1211_v44, %v3820_v60 }
 0x943   :  { %1223 = vrot.lane.b32.xlu0 %v1222_v34, %s3502_s18  ;;  %v2659_v47 = vmul.f32 -1.442695, %v1213_v45 }
 0x947   :  { %v3412_v35 = vpop.eup %3411 }
 0x948   :  { %v1117_v37 = vadd.f32 1.0, %v3412_v35  ;;  %v1123_v42 = vpop.permute.xlu1 %1122 }
 0x94a   :  { %3413 = vrcp.f32 %v1117_v37 }
 0x94b   :  { %3415 = vpow2.f32 %v2659_v47 }
 0x954   :  { %v3414_v40 = vpop.eup %3413 }
 0x955   :  { %v1125_v43 = vmul.f32 %v3414_v40, %v1123_v42  ;;  %v3416_v49 = vpop.eup %3415  ;;  %v1132_v61 = vsub.f32 1.0, %v3414_v40  ;;  %v1138_v0 = vmul.f32 %v3414_v40, %v3961_v9 }
 0x956   :  { %v1217_v50 = vadd.f32 1.0, %v3416_v49 }
 0x957   :  { %1127 = vrot.lane.b32.xlu1 %v1125_v43, %s3502_s18 }
 0x958   :  { %3417 = vrcp.f32 %v1217_v50 }
 0x962   :  { %v3418_v51 = vpop.eup %3417 }
 0x963   :  { %v1233_v4 = vsub.f32 1.0, %v3418_v51  ;;  %v1241_v7 = vmul.f32 %v3418_v51, %v1239_v3 }
 0x9b5   :  { %v1224_v52 = vpop.permute.xlu0 %1223 }
 0x9b6   :  { %v1226_v53 = vmul.f32 %v3418_v51, %v1224_v52 }
 0x9b8   :  { %1228 = vrot.lane.b32.xlu0 %v1226_v53, %s3502_s18 }
 0x9c9   :  { %v1128_v54 = vpop.permute.xlu1 %1127 }
 0x9ca   :  { %v1130_v55 = vadd.f32 %v1128_v54, %v1035_v27 }
 0x9cc   :  { %3419 = vtanh.f32 %v1130_v55 }
 0x9d6   :  { %v3420_v56 = vpop.eup %3419 }
 0x9d7   :  { %1134 = vrot.lane.b32.xlu1 %v3420_v56, %s3506_s5 }
 0xa2a   :  { %v1229_v57 = vpop.permute.xlu0 %1228 }
 0xa2b   :  { %v1231_v58 = vadd.f32 %v1229_v57, %v3820_v60 }
 0xa2d   :  { %3421 = vtanh.f32 %v1231_v58 }
 0xa37   :  { %v3422_v59 = vpop.eup %3421 }
 0xa38   :  { %1235 = vrot.lane.b32.xlu0 %v3422_v59, %s3506_s5 }
 0xa49   :  { %v1135_v62 = vpop.permute.xlu1 %1134 }
 0xa4a   :  { %v1137_v1 = vmul.f32 %v1135_v62, %v1132_v61 }
 0xa4c   :  { %v4003_v2 = vadd.f32 %v1138_v0, %v1137_v1 }
 0xa4e   :  { %1320 = vrot.lane.b32.xlu1 %v4003_v2, %s3506_s5 }
 0xaaa   :  { %v1236_v6 = vpop.permute.xlu0 %1235 }
 0xaab   :  { %v1238_v60 = vmul.f32 %v1236_v6, %v1233_v4 }
 0xaad   :  { %v4008_v8 = vadd.f32 %v1241_v7, %v1238_v60 }
 0xaaf   :  { %v1244_v10 = vrot.slane %v4008_v8, 6 }
 0xab1   :  { %1245 = vrot.lane.b32.xlu0 %v1244_v10, %s3506_s5 }
 0xac0   :  { %v1321_v9 = vpop.permute.xlu1 %1320 }
 0xac1   :  { %3016 = vmatmul.mubr.msk.f32.vlgmr.msra.gmra.mrb[14].mxu1 %vm283_vm1, %v1321_v9 }
 0xac2   :  { %3305 = vmatpush3.bf16.msra.mxu1 %v3851_v22  ;;  %3037 = vmatprep.mubr.msk.f32.mxu1 %vm3504_vm0, %v3505_v48 }
 0xac3   :  { %3306 = vmatprep.subr.bf16.mxu1 %v3503_v39 }
 0xac6   :  { %3308 = vmatpush3.bf16.msra.mxu1 %v3864_v26 }
 0xac7   :  { %3315 = vmatprep.subr.bf16.mxu1 %v3503_v39 }
 0xb23   :  { %v1246_v11 = vpop.permute.xlu0 %1245 }
 0xb24   :  { %3005 = vmatmul.mubr.msk.f32.vlgmr.msra.gmra.mrb[14].mxu0 %vm283_vm1, %v1246_v11 }
 0xb25   :  { %3299 = vmatpush3.bf16.msra.mxu0 %v3779_v38  ;;  %3026 = vmatprep.mubr.msk.f32.mxu0 %vm3504_vm0, %v3505_v48 }
 0xb26   :  { %3300 = vmatprep.subr.bf16.mxu0 %v3503_v39 }
 0xb29   :  { %3302 = vmatpush3.bf16.msra.mxu0 %v3802_v46 }
 0xb2a   :  { %3309 = vmatprep.subr.bf16.mxu0 %v3503_v39 }
 0xb2c   :  { %3027 = vmatmul.mubr.msk.f32.vlgmr.msra.gmra.mrb[16].mxu0 %vm283_vm1, %v1246_v11 }
 0xb2d   :  { %3311 = vmatpush3.bf16.msra.mxu0 %v3840_v18  ;;  %3048 = vmatprep.mubr.msk.f32.mxu0 %vm3504_vm0, %v3505_v48 }
 0xb2e   :  { %3312 = vmatprep.subr.bf16.mxu0 %v3503_v39 }
 0xb31   :  { %3314 = vmatpush3.bf16.msra.mxu0 %v3860_v25 }
 0xb32   :  { %3321 = vmatprep.subr.bf16.mxu0 %v3503_v39 }
 0xb94   :  { %v1390_v12 = vpop.f32.mrb[14].mxu1 }
 0xb95   :  { %v1401_v13 = vadd.f32 %v1390_v12, %v3887_v36  ;;  %v3017_v14 = vpop.f32.mrb[15].mxu1 }
 0xb97   :  { %1403 = vrot.lane.b32.xlu1 %v1401_v13, %s3502_s18 }
 0xbf7   :  { %v1315_v16 = vpop.f32.mrb[14].mxu0 }
 0xbf8   :  { %v1316_v17 = vadd.f32 %v3908_v41, %v1315_v16  ;;  %v3006_v19 = vpop.f32.mrb[15].mxu0 }
 0xbfa   :  { %v1394_v15 = vadd.f32 %v1390_v12, %v1316_v17 }
 0xbfc   :  { %v2662_v20 = vmul.f32 -1.442695, %v1394_v15 }
 0xbfe   :  { %3423 = vpow2.f32 %v2662_v20 }
 0xbff   :  { %v1487_v21 = vpop.f32.mrb[16].mxu0 }
 0xc00   :  { %v1498_v23 = vadd.f32 %v1487_v21, %v3822_v63  ;;  %v3028_v24 = vpop.f32.mrb[17].mxu0  ;;  %v1491_v32 = vadd.f32 %v1487_v21, %v3825_v5 }
 0xc02   :  { %1500 = vrot.lane.b32.xlu0 %v1498_v23, %s3502_s18  ;;  %v2664_v33 = vmul.f32 -1.442695, %v1491_v32 }
 0xc08   :  { %v3424_v27 = vpop.eup %3423 }
 0xc09   :  { %v1398_v28 = vadd.f32 1.0, %v3424_v27  ;;  %v1404_v30 = vpop.permute.xlu1 %1403 }
 0xc0b   :  { %3425 = vrcp.f32 %v1398_v28 }
 0xc0c   :  { %3427 = vpow2.f32 %v2664_v33 }
 0xc15   :  { %v3426_v29 = vpop.eup %3425 }
 0xc16   :  { %v1406_v31 = vmul.f32 %v3426_v29, %v1404_v30  ;;  %v3428_v34 = vpop.eup %3427  ;;  %v1413_v51 = vsub.f32 1.0, %v3426_v29  ;;  %v1419_v53 = vmul.f32 %v3426_v29, %v4003_v2 }
 0xc17   :  { %v1495_v35 = vadd.f32 1.0, %v3428_v34 }
 0xc18   :  { %1408 = vrot.lane.b32.xlu1 %v1406_v31, %s3502_s18 }
 0xc19   :  { %3429 = vrcp.f32 %v1495_v35 }
 0xc23   :  { %v3430_v37 = vpop.eup %3429 }
 0xc24   :  { %v1510_v56 = vsub.f32 1.0, %v3430_v37  ;;  %v1517_v58 = vmul.f32 %v3430_v37, %v1244_v10 }
 0xc74   :  { %v1501_v40 = vpop.permute.xlu0 %1500 }
 0xc75   :  { %v1503_v42 = vmul.f32 %v3430_v37, %v1501_v40 }
 0xc77   :  { %1505 = vrot.lane.b32.xlu0 %v1503_v42, %s3502_s18 }
 0xc8a   :  { %v1409_v43 = vpop.permute.xlu1 %1408 }
 0xc8b   :  { %v1411_v44 = vadd.f32 %v1409_v43, %v1316_v17 }
 0xc8d   :  { %3431 = vtanh.f32 %v1411_v44 }
 0xc97   :  { %v3432_v45 = vpop.eup %3431 }
 0xc98   :  { %1415 = vrot.lane.b32.xlu1 %v3432_v45, %s3506_s5 }
 0xce9   :  { %v1506_v47 = vpop.permute.xlu0 %1505 }
 0xcea   :  { %v1508_v49 = vadd.f32 %v1506_v47, %v3825_v5 }
 0xcec   :  { %3433 = vtanh.f32 %v1508_v49 }
 0xcf6   :  { %v3434_v50 = vpop.eup %3433 }
 0xcf7   :  { %1512 = vrot.lane.b32.xlu0 %v3434_v50, %s3506_s5 }
 0xd0a   :  { %v1416_v52 = vpop.permute.xlu1 %1415 }
 0xd0b   :  { %v1418_v54 = vmul.f32 %v1416_v52, %v1413_v51 }
 0xd0d   :  { %v4047_v55 = vadd.f32 %v1419_v53, %v1418_v54 }
 0xd0f   :  { %1595 = vrot.lane.b32.xlu1 %v4047_v55, %s3506_s5 }
 0xd69   :  { %v1513_v57 = vpop.permute.xlu0 %1512 }
 0xd6a   :  { %v1515_v59 = vmul.f32 %v1513_v57, %v1510_v56 }
 0xd6c   :  { %v4053_v61 = vadd.f32 %v1517_v58, %v1515_v59 }
 0xd6e   :  { %1520 = vrot.lane.b32.xlu0 %v4053_v61, %s3506_s5  ;;  %v1795_v45 = vrot.slane %v4053_v61, 6 }
 0xd81   :  { %v1596_v62 = vpop.permute.xlu1 %1595 }
 0xd82   :  { %3049 = vmatmul.mubr.msk.f32.vlgmr.msra.gmra.mrb[18].mxu0 %vm283_vm1, %v1596_v62 }
 0xd83   :  { %3323 = vmatpush3.bf16.msra.mxu0 %v3851_v22  ;;  %3070 = vmatprep.mubr.msk.f32.mxu0 %vm3504_vm0, %v3505_v48 }
 0xd84   :  { %3324 = vmatprep.subr.bf16.mxu0 %v3503_v39 }
 0xd87   :  { %3326 = vmatpush3.bf16.msra.mxu0 %v3864_v26 }
 0xd88   :  { %3333 = vmatprep.subr.bf16.mxu0 %v3503_v39 }
 0xde0   :  { %v1521_v0 = vpop.permute.xlu0 %1520 }
 0xde1   :  { %3038 = vmatmul.mubr.msk.f32.vlgmr.msra.gmra.mrb[16].mxu1 %vm283_vm1, %v1521_v0 }
 0xde2   :  { %3317 = vmatpush3.bf16.msra.mxu1 %v3779_v38  ;;  %3059 = vmatprep.mubr.msk.f32.mxu1 %vm3504_vm0, %v3505_v48 }
 0xde3   :  { %3318 = vmatprep.subr.bf16.mxu1 %v3503_v39 }
 0xde6   :  { %3320 = vmatpush3.bf16.msra.mxu1 %v3802_v46 }
 0xde7   :  { %3327 = vmatprep.subr.bf16.mxu1 %v3503_v39 }
 0xde9   :  { %3060 = vmatmul.mubr.msk.f32.vlgmr.msra.gmra.mrb[18].mxu1 %vm283_vm1, %v1521_v0 }
 0xdea   :  { %3329 = vmatpush3.bf16.msra.mxu1 %v3840_v18  ;;  %3081 = vmatprep.mubr.msk.f32.mxu1 %vm3504_vm0, %v3505_v48 }
 0xdeb   :  { %3330 = vmatprep.subr.bf16.mxu1 %v3503_v39 }
 0xdee   :  { %3332 = vmatpush3.bf16.msra.mxu1 %v3860_v25 }
 0xdef   :  { %3339 = vmatprep.subr.bf16.mxu1 %v3503_v39 }
 0xe55   :  { %v1665_v1 = vpop.f32.mrb[18].mxu0 }
 0xe56   :  { %v1676_v2 = vadd.f32 %v1665_v1, %v3887_v36  ;;  %v3050_v3 = vpop.f32.mrb[19].mxu0 }
 0xe58   :  { %1678 = vrot.lane.b32.xlu0 %v1676_v2, %s3502_s18 }
 0xeb4   :  { %v1590_v4 = vpop.f32.mrb[16].mxu1 }
 0xeb5   :  { %v1591_v6 = vadd.f32 %v3908_v41, %v1590_v4  ;;  %v3039_v7 = vpop.f32.mrb[17].mxu1 }
 0xeb7   :  { %v1669_v60 = vadd.f32 %v1665_v1, %v1591_v6 }
 0xeb9   :  { %v2667_v8 = vmul.f32 -1.442695, %v1669_v60 }
 0xebb   :  { %3435 = vpow2.f32 %v2667_v8 }
 0xebc   :  { %v1762_v10 = vpop.f32.mrb[18].mxu1 }
 0xebd   :  { %v1776_v9 = vadd.f32 %v1762_v10, %v3822_v63  ;;  %v3061_v11 = vpop.f32.mrb[19].mxu1  ;;  %v1767_v15 = vrot.slane %v1762_v10, 6 }
 0xebf   :  { %v1778_v12 = vrot.slane %v1776_v9, 6  ;;  %v1769_v20 = vadd.f32 %v1767_v15, %v3825_v5 }
 0xec1   :  { %1779 = vrot.lane.b32.xlu1 %v1778_v12, %s3502_s18  ;;  %v2669_v21 = vmul.f32 -1.442695, %v1769_v20 }
 0xec5   :  { %v3436_v13 = vpop.eup %3435 }
 0xec6   :  { %v1673_v14 = vadd.f32 1.0, %v3436_v13 }
 0xec8   :  { %3437 = vrcp.f32 %v1673_v14 }
 0xec9   :  { %3439 = vpow2.f32 %v2669_v21 }
 0xeca   :  { %v1679_v17 = vpop.permute.xlu0 %1678 }
 0xed2   :  { %v3438_v16 = vpop.eup %3437 }
 0xed3   :  { %v1681_v19 = vmul.f32 %v3438_v16, %v1679_v17  ;;  %v3440_v23 = vpop.eup %3439  ;;  %v1688_v37 = vsub.f32 1.0, %v3438_v16  ;;  %v1694_v42 = vmul.f32 %v3438_v16, %v4047_v55 }
 0xed4   :  { %v1773_v24 = vadd.f32 1.0, %v3440_v23 }
 0xed5   :  { %1683 = vrot.lane.b32.xlu0 %v1681_v19, %s3502_s18 }
 0xed6   :  { %3441 = vrcp.f32 %v1773_v24 }
 0xee0   :  { %v3442_v27 = vpop.eup %3441 }
 0xee1   :  { %v1789_v47 = vsub.f32 1.0, %v3442_v27  ;;  %v1797_v50 = vmul.f32 %v3442_v27, %v1795_v45 }
 0xf33   :  { %v1780_v28 = vpop.permute.xlu1 %1779 }
 0xf34   :  { %v1782_v29 = vmul.f32 %v3442_v27, %v1780_v28 }
 0xf36   :  { %1784 = vrot.lane.b32.xlu1 %v1782_v29, %s3502_s18 }
 0xf47   :  { %v1684_v30 = vpop.permute.xlu0 %1683 }
 0xf48   :  { %v1686_v31 = vadd.f32 %v1684_v30, %v1591_v6 }
 0xf4a   :  { %3443 = vtanh.f32 %v1686_v31 }
 0xf54   :  { %v3444_v32 = vpop.eup %3443 }
 0xf55   :  { %1690 = vrot.lane.b32.xlu0 %v3444_v32, %s3506_s5 }
 0xfa8   :  { %v1785_v33 = vpop.permute.xlu1 %1784 }
 0xfa9   :  { %v1787_v34 = vadd.f32 %v1785_v33, %v3825_v5 }
 0xfab   :  { %3445 = vtanh.f32 %v1787_v34 }
 0xfb5   :  { %v3446_v35 = vpop.eup %3445 }
 0xfb6   :  { %1791 = vrot.lane.b32.xlu1 %v3446_v35, %s3506_s5 }
 0xfc7   :  { %v1691_v40 = vpop.permute.xlu0 %1690 }
 0xfc8   :  { %v1693_v43 = vmul.f32 %v1691_v40, %v1688_v37 }
 0xfca   :  { %v4090_v44 = vadd.f32 %v1694_v42, %v1693_v43 }
 0xfcc   :  { %1876 = vrot.lane.b32.xlu0 %v4090_v44, %s3506_s5 }
0x1028   :  { %v1792_v49 = vpop.permute.xlu1 %1791 }
0x1029   :  { %v1794_v51 = vmul.f32 %v1792_v49, %v1789_v47 }
0x102b   :  { %v4095_v52 = vadd.f32 %v1797_v50, %v1794_v51 }
0x102d   :  { %v1800_v53 = vrot.slane %v4095_v52, 2  ;;  %v2076_v34 = vrot.slane %v4095_v52, 6 }
0x102f   :  { %1801 = vrot.lane.b32.xlu1 %v1800_v53, %s3506_s5 }
0x103e   :  { %v1877_v54 = vpop.permute.xlu0 %1876 }
0x103f   :  { %3082 = vmatmul.mubr.msk.f32.vlgmr.msra.gmra.mrb[20].mxu1 %vm283_vm1, %v1877_v54 }
0x1040   :  { %3341 = vmatpush3.bf16.msra.mxu1 %v3851_v22  ;;  %3103 = vmatprep.mubr.msk.f32.mxu1 %vm3504_vm0, %v3505_v48 }
0x1041   :  { %3342 = vmatprep.subr.bf16.mxu1 %v3503_v39 }
0x1044   :  { %3344 = vmatpush3.bf16.msra.mxu1 %v3864_v26 }
0x1045   :  { %3351 = vmatprep.subr.bf16.mxu1 %v3503_v39 }
0x10a1   :  { %v1802_v55 = vpop.permute.xlu1 %1801 }
0x10a2   :  { %3071 = vmatmul.mubr.msk.f32.vlgmr.msra.gmra.mrb[20].mxu0 %vm283_vm1, %v1802_v55 }
0x10a3   :  { %3335 = vmatpush3.bf16.msra.mxu0 %v3779_v38  ;;  %3092 = vmatprep.mubr.msk.f32.mxu0 %vm3504_vm0, %v3505_v48 }
0x10a4   :  { %3336 = vmatprep.subr.bf16.mxu0 %v3503_v39 }
0x10a7   :  { %3338 = vmatpush3.bf16.msra.mxu0 %v3802_v46 }
0x10a8   :  { %3345 = vmatprep.subr.bf16.mxu0 %v3503_v39 }
0x10aa   :  { %3093 = vmatmul.mubr.msk.f32.vlgmr.msra.gmra.mrb[22].mxu0 %vm283_vm1, %v1802_v55 }
0x10ab   :  { %3347 = vmatpush3.bf16.msra.mxu0 %v3840_v18  ;;  %3114 = vmatprep.mubr.msk.f32.mxu0 %vm3504_vm0, %v3505_v48 }
0x10ac   :  { %3348 = vmatprep.subr.bf16.mxu0 %v3503_v39 }
0x10af   :  { %3350 = vmatpush3.bf16.msra.mxu0 %v3860_v25 }
0x10b0   :  { %3357 = vmatprep.subr.bf16.mxu0 %v3503_v39 }
0x1112   :  { %v1946_v56 = vpop.f32.mrb[20].mxu1 }
0x1113   :  { %v1957_v57 = vadd.f32 %v1946_v56, %v3887_v36  ;;  %v3083_v58 = vpop.f32.mrb[21].mxu1 }
0x1115   :  { %1959 = vrot.lane.b32.xlu0 %v1957_v57, %s3502_s18 }
0x1175   :  { %v1871_v59 = vpop.f32.mrb[20].mxu0 }
0x1176   :  { %v1872_v61 = vadd.f32 %v3908_v41, %v1871_v59  ;;  %v3072_v62 = vpop.f32.mrb[21].mxu0 }
0x1178   :  { %v1950_v0 = vadd.f32 %v1946_v56, %v1872_v61 }
0x117a   :  { %v2672_v1 = vmul.f32 -1.442695, %v1950_v0 }
0x117c   :  { %3447 = vpow2.f32 %v2672_v1 }
0x117d   :  { %v2043_v2 = vpop.f32.mrb[22].mxu0 }
0x117e   :  { %v2057_v3 = vadd.f32 %v2043_v2, %v3822_v63  ;;  %v3094_v4 = vpop.f32.mrb[23].mxu0  ;;  %v2048_v11 = vrot.slane %v2043_v2, 4 }
0x1180   :  { %v2059_v6 = vrot.slane %v2057_v3, 4  ;;  %v2050_v12 = vadd.f32 %v2048_v11, %v3825_v5 }
0x1182   :  { %2060 = vrot.lane.b32.xlu1 %v2059_v6, %s3502_s18  ;;  %v2674_v13 = vmul.f32 -1.442695, %v2050_v12 }
0x1186   :  { %v3448_v7 = vpop.eup %3447 }
0x1187   :  { %v1954_v60 = vadd.f32 1.0, %v3448_v7  ;;  %v1960_v10 = vpop.permute.xlu0 %1959 }
0x1189   :  { %3449 = vrcp.f32 %v1954_v60 }
0x118a   :  { %3451 = vpow2.f32 %v2674_v13 }
0x1193   :  { %v3450_v8 = vpop.eup %3449 }
0x1194   :  { %v1962_v9 = vmul.f32 %v3450_v8, %v1960_v10  ;;  %v3452_v14 = vpop.eup %3451  ;;  %v1969_v29 = vsub.f32 1.0, %v3450_v8  ;;  %v1975_v31 = vmul.f32 %v3450_v8, %v4090_v44 }
0x1195   :  { %v2054_v16 = vadd.f32 1.0, %v3452_v14 }
0x1196   :  { %1964 = vrot.lane.b32.xlu0 %v1962_v9, %s3502_s18 }
0x1197   :  { %3453 = vrcp.f32 %v2054_v16 }
0x11a1   :  { %v3454_v17 = vpop.eup %3453 }
0x11a2   :  { %v2070_v35 = vsub.f32 1.0, %v3454_v17  ;;  %v2078_v40 = vmul.f32 %v3454_v17, %v2076_v34 }
0x11f4   :  { %v2061_v19 = vpop.permute.xlu1 %2060 }
0x11f5   :  { %v2063_v15 = vmul.f32 %v3454_v17, %v2061_v19 }
0x11f7   :  { %2065 = vrot.lane.b32.xlu1 %v2063_v15, %s3502_s18 }
0x1208   :  { %v1965_v20 = vpop.permute.xlu0 %1964 }
0x1209   :  { %v1967_v21 = vadd.f32 %v1965_v20, %v1872_v61 }
0x120b   :  { %3455 = vtanh.f32 %v1967_v21 }
0x1215   :  { %v3456_v23 = vpop.eup %3455 }
0x1216   :  { %1971 = vrot.lane.b32.xlu0 %v3456_v23, %s3506_s5 }
0x1269   :  { %v2066_v24 = vpop.permute.xlu1 %2065 }
0x126a   :  { %v2068_v27 = vadd.f32 %v2066_v24, %v3825_v5 }
0x126c   :  { %3457 = vtanh.f32 %v2068_v27 }
0x1276   :  { %v3458_v28 = vpop.eup %3457 }
0x1277   :  { %2072 = vrot.lane.b32.xlu1 %v3458_v28, %s3506_s5 }
0x1288   :  { %v1972_v30 = vpop.permute.xlu0 %1971 }
0x1289   :  { %v1974_v32 = vmul.f32 %v1972_v30, %v1969_v29 }
0x128b   :  { %v4132_v33 = vadd.f32 %v1975_v31, %v1974_v32  ;;  %v3477_v31 = vld [vmem:[%s4224_s7] ss:$0 sm:$0xff] }
0x128d   :  { %2157 = vrot.lane.b32.xlu0 %v4132_v33, %s3506_s5 }
0x12e9   :  { %v2073_v37 = vpop.permute.xlu1 %2072 }
0x12ea   :  { %v2075_v42 = vmul.f32 %v2073_v37, %v2070_v35 }
0x12ec   :  { %v4137_v43 = vadd.f32 %v2078_v40, %v2075_v42 }
0x12ee   :  { %v2081_v45 = vrot.slane %v4137_v43, 4  ;;  %v2357_v16 = vrot.slane %v4137_v43, 6 }
0x12f0   :  { %2082 = vrot.lane.b32.xlu1 %v2081_v45, %s3506_s5 }
0x12ff   :  { %v2158_v47 = vpop.permute.xlu0 %2157 }
0x1300   :  { %3115 = vmatmul.mubr.msk.f32.vlgmr.msra.gmra.mrb[24].mxu0 %vm283_vm1, %v2158_v47  ;;  %v2539_v47 = vld [vmem:[%s4226_s9] sm:$0xff] }
0x1301   :  { %3359 = vmatpush3.bf16.msra.mxu0 %v3851_v22  ;;  %3136 = vmatprep.mubr.msk.f32.mxu0 %vm3504_vm0, %v3505_v48 }
0x1302   :  { %3360 = vmatprep.subr.bf16.mxu0 %v3503_v39 }
0x1305   :  { %3362 = vmatpush3.bf16.msra.mxu0 %v3864_v26 }
0x1306   :  { %3369 = vmatprep.subr.bf16.mxu0 %v3503_v39 }
0x1362   :  { %v2083_v44 = vpop.permute.xlu1 %2082 }
0x1363   :  { %3104 = vmatmul.mubr.msk.f32.vlgmr.msra.gmra.mrb[22].mxu1 %vm283_vm1, %v2083_v44 }
0x1364   :  { %3353 = vmatpush3.bf16.msra.mxu1 %v3779_v38  ;;  %3125 = vmatprep.mubr.msk.f32.mxu1 %vm3504_vm0, %v3505_v48 }
0x1365   :  { %3354 = vmatprep.subr.bf16.mxu1 %v3503_v39 }
0x1368   :  { %3356 = vmatpush3.bf16.msra.mxu1 %v3802_v46 }
0x1369   :  { %3363 = vmatprep.subr.bf16.mxu1 %v3503_v39 }
0x136b   :  { %3126 = vmatmul.mubr.msk.f32.vlgmr.msra.gmra.mrb[24].mxu1 %vm283_vm1, %v2083_v44  ;;  %v2540_v44 = vld [vmem:[%s4226_s9 + $0x8] sm:$0xff] }
0x136c   :  { %3365 = vmatpush3.bf16.msra.mxu1 %v3840_v18  ;;  %3147 = vmatprep.mubr.msk.f32.mxu1 %vm3504_vm0, %v3505_v48 }
0x136d   :  { %3366 = vmatprep.subr.bf16.mxu1 %v3503_v39 }
0x1370   :  { %3368 = vmatpush3.bf16.msra.mxu1 %v3860_v25 }
0x13d3   :  { %v2227_v38 = vpop.f32.mrb[24].mxu0 }
0x13d4   :  { %v2238_v22 = vadd.f32 %v2227_v38, %v3887_v36  ;;  %v3116_v26 = vpop.f32.mrb[25].mxu0 }
0x13d5   :  { %v2542_v26 = vld [vmem:[%s4226_s9 + $0x18] sm:$0xff] }
0x13d6   :  { %2240 = vrot.lane.b32.xlu0 %v2238_v22, %s3502_s18  ;;  %v3370_v22 = vpack.c.bf16 %v2540_v44, %v2539_v47 }
0x1436   :  { %v2152_v46 = vpop.f32.mrb[22].mxu1 }
0x1437   :  { %v2153_v49 = vadd.f32 %v3908_v41, %v2152_v46  ;;  %v3105_v50 = vpop.f32.mrb[23].mxu1 }
0x1439   :  { %v2231_v51 = vadd.f32 %v2227_v38, %v2153_v49  ;;  %v2541_v38 = vld [vmem:[%s4226_s9 + $0x10] sm:$0xff] }
0x143a   :  { %v3373_v46 = vpack.c.bf16 %v2542_v26, %v2541_v38 }
0x143b   :  { %v2677_v52 = vmul.f32 -1.442695, %v2231_v51 }
0x143d   :  { %3459 = vpow2.f32 %v2677_v52 }
0x143e   :  { %v2324_v18 = vpop.f32.mrb[24].mxu1 }
0x143f   :  { %v2338_v53 = vadd.f32 %v2324_v18, %v3822_v63  ;;  %v3127_v54 = vpop.f32.mrb[25].mxu1  ;;  %v2329_v41 = vrot.slane %v2324_v18, 2 }
0x1441   :  { %v2340_v55 = vrot.slane %v2338_v53, 2  ;;  %v2331_v61 = vadd.f32 %v2329_v41, %v3825_v5 }
0x1443   :  { %2341 = vrot.lane.b32.xlu1 %v2340_v55, %s3502_s18  ;;  %v2679_v62 = vmul.f32 -1.442695, %v2331_v61  ;;  %v2683_v55 = vld [vmem:[%s4227_s10] ss:$0 sm:$0xff] }
0x1447   :  { %v3460_v25 = vpop.eup %3459 }
0x1448   :  { %v2235_v56 = vadd.f32 1.0, %v3460_v25  ;;  %v2241_v58 = vpop.permute.xlu0 %2240 }
0x144a   :  { %3461 = vrcp.f32 %v2235_v56 }
0x144b   :  { %3463 = vpow2.f32 %v2679_v62 }
0x1454   :  { %v3462_v57 = vpop.eup %3461 }
0x1455   :  { %v2243_v59 = vmul.f32 %v3462_v57, %v2241_v58  ;;  %v3464_v0 = vpop.eup %3463  ;;  %v2250_v9 = vsub.f32 1.0, %v3462_v57  ;;  %v2256_v12 = vmul.f32 %v3462_v57, %v4132_v33 }
0x1456   :  { %v2335_v1 = vadd.f32 1.0, %v3464_v0 }
0x1457   :  { %2245 = vrot.lane.b32.xlu0 %v2243_v59, %s3502_s18 }
0x1458   :  { %3465 = vrcp.f32 %v2335_v1 }
0x1462   :  { %v3466_v63 = vpop.eup %3465 }
0x1463   :  { %v2351_v17 = vsub.f32 1.0, %v3466_v63  ;;  %v2359_v15 = vmul.f32 %v3466_v63, %v2357_v16 }
0x14b5   :  { %v2342_v2 = vpop.permute.xlu1 %2341 }
0x14b6   :  { %v2344_v3 = vmul.f32 %v3466_v63, %v2342_v2 }
0x14b8   :  { %2346 = vrot.lane.b32.xlu1 %v2344_v3, %s3502_s18 }
0x14c9   :  { %v2246_v4 = vpop.permute.xlu0 %2245 }
0x14ca   :  { %v2248_v6 = vadd.f32 %v2246_v4, %v2153_v49 }
0x14cc   :  { %3467 = vtanh.f32 %v2248_v6 }
0x14d6   :  { %v3468_v7 = vpop.eup %3467 }
0x14d7   :  { %2252 = vrot.lane.b32.xlu0 %v3468_v7, %s3506_s5 }
0x152a   :  { %v2347_v60 = vpop.permute.xlu1 %2346 }
0x152b   :  { %v2349_v8 = vadd.f32 %v2347_v60, %v3825_v5 }
0x152d   :  { %3469 = vtanh.f32 %v2349_v8 }
0x1537   :  { %v3470_v10 = vpop.eup %3469 }
0x1538   :  { %2353 = vrot.lane.b32.xlu1 %v3470_v10, %s3506_s5 }
0x1549   :  { %v2253_v11 = vpop.permute.xlu0 %2252 }
0x154a   :  { %v2255_v13 = vmul.f32 %v2253_v11, %v2250_v9 }
0x154c   :  { %v2257_v14 = vadd.f32 %v2256_v12, %v2255_v13 }
0x154e   :  { %2438 = vrot.lane.b32.xlu0 %v2257_v14, %s3506_s5 }
0x15aa   :  { %v2354_v19 = vpop.permute.xlu1 %2353 }
0x15ab   :  { %v2356_v20 = vmul.f32 %v2354_v19, %v2351_v17 }
0x15ad   :  { %v2360_v21 = vadd.f32 %v2359_v15, %v2356_v20 }
0x15af   :  { %v2362_v5 = vrot.slane %v2360_v21, 6 }
0x15b1   :  { %2363 = vrot.lane.b32.xlu1 %v2362_v5, %s3506_s5 }
0x15c0   :  { %v2439_v23 = vpop.permute.xlu0 %2438 }
0x15c1   :  { %3148 = vmatmul.mubr.msk.f32.vlgmr.msra.gmra.mrb[26].mxu1 %vm283_vm1, %v2439_v23 }
0x1623   :  { %v2364_v24 = vpop.permute.xlu1 %2363 }
0x1624   :  { %3137 = vmatmul.mubr.msk.f32.vlgmr.msra.gmra.mrb[26].mxu0 %vm283_vm1, %v2364_v24 }
0x1625   :  { %3158 = vmatprep.mubr.msk.f32.mxu0 %vm3504_vm0, %v3505_v48  ;;  %3371 = vmatpush3.bf16.msra.mxu0 %v3370_v22 }
0x1626   :  { %3372 = vmatprep.subr.bf16.mxu0 %v3503_v39 }
0x1629   :  { %3374 = vmatpush3.bf16.msra.mxu0 %v3373_v46 }
0x1694   :  { %v2508_v27 = vpop.f32.mrb[26].mxu1 }
0x1695   :  { %v2519_v28 = vadd.f32 %v2508_v27, %v3887_v36  ;;  %v3149_v29 = vpop.f32.mrb[27].mxu1 }
0x1697   :  { %2521 = vrot.lane.b32.xlu0 %v2519_v28, %s3502_s18 }
0x16f7   :  { %v2433_v30 = vpop.f32.mrb[26].mxu0 }
0x16f8   :  { %v2434_v32 = vadd.f32 %v3477_v31, %v2433_v30  ;;  %v3138_v33 = vpop.f32.mrb[27].mxu0 }
0x16fa   :  { %v2512_v34 = vadd.f32 %v2508_v27, %v2434_v32 }
0x16fc   :  { %v2682_v35 = vmul.f32 -1.442695, %v2512_v34 }
0x16fe   :  { %3471 = vpow2.f32 %v2682_v35 }
0x1708   :  { %v3472_v37 = vpop.eup %3471 }
0x1709   :  { %v2516_v40 = vadd.f32 1.0, %v3472_v37  ;;  %v2522_v42 = vpop.permute.xlu0 %2521 }
0x170b   :  { %3473 = vrcp.f32 %v2516_v40 }
0x1715   :  { %v3474_v48 = vpop.eup %3473 }
0x1716   :  { %v2524_v43 = vmul.f32 %v3474_v48, %v2522_v42  ;;  %v2531_v50 = vsub.f32 1.0, %v3474_v48  ;;  %v2537_v52 = vmul.f32 %v3474_v48, %v2257_v14 }
0x1718   :  { %2526 = vrot.lane.b32.xlu1 %v2524_v43, %s3502_s18 }
0x178a   :  { %v2527_v36 = vpop.permute.xlu1 %2526 }
0x178b   :  { %v2529_v45 = vadd.f32 %v2527_v36, %v2434_v32 }
0x178d   :  { %3475 = vtanh.f32 %v2529_v45 }
0x1797   :  { %v3476_v49 = vpop.eup %3475 }
0x1798   :  { %2533 = vrot.lane.b32.xlu0 %v3476_v49, %s3506_s5 }
0x180a   :  { %v2534_v51 = vpop.permute.xlu0 %2533 }
0x180b   :  { %v2536_v18 = vmul.f32 %v2534_v51, %v2531_v50 }
0x180d   :  { %v2538_v53 = vadd.f32 %v2537_v52, %v2536_v18 }
0x180f   :  { %2551 = vrot.lane.b32.xlu1 %v2538_v53, %s3506_s5 }
0x1881   :  { %v2552_v54 = vpop.permute.xlu1 %2551 }
0x1882   :  { %3159 = vmatmul.mubr.msk.f32.vlgmr.msra.gmra.mrb[28].mxu0 %vm283_vm1, %v2552_v54 }
0x1955   :  { %v2621_v39 = vpop.f32.mrb[28].mxu0 }
0x1956   :  { %v2622_v25 = vadd.f32 %v2683_v55, %v2621_v39  ;;  %v3160_v56 = vpop.f32.mrb[29].mxu0 }
0x1958   :  { %2626 = vst.msk [vmem:[#allocation2] sm:$0x3] %vm2625_vm2, %v2622_v25 }
0x1959   :  { %3489 = shalt.err (!%p3486_p4)
}
0x195a   :  { %s3490_s25 = scalar_lea.hbm %s4228_s11, 32 }
0x195b   :  { %p3491_p5 = scmp.ne.s32.totalorder %s4228_s11, %s3490_s25  ;;  %p3494_p6 = scmp.lt.u32.totalorder %s3490_s25, %s4228_s11 }
0x195d   :  { %p3496_p7 = pnand %p3494_p6, %p3491_p5 }
0x195f   :  { %3499 = shalt.err (!%p3496_p7)
}
0x1960   :  { %2636 = dma.vmem_to_hbm [thread:$0]  %s2634_s22, 32, %s4228_s11, [#allocation3]  }
0x1961   :  { %3500 = dma.done.wait [#allocation3], 32  }
0x1962   :  { %3501 = vsyncadd [#allocation3], 4294967264 }
0x1963   :  { %2640 = vsyncpa [#allocation3], 1 }

</bundles_post_ra>
